<compile_context>
chip_gen: v7x
topology: tpu7x:2x2x1
jax: 0.10.0
libtpu: 0.0.40
codegen_flags: <defaults>
</compile_context>

<pallas_src>
import jax
import jax.numpy as jnp
from jax import lax
from jax.experimental import pallas as pl
from jax.experimental.pallas import tpu as pltpu

THRESHOLD = 1.0 - 0.1   # ACT_basic: self.threshold = 1 - 0.1
LN_EPS = 1e-6           # custom LayerNorm eps


def decoder_act_kernel(x_ref, we_ref, time_ref, pos_ref, wp_ref, bp_ref,
                       wf_ref, bf_ref, lng_ref, lnb_ref,
                       y_ref, rem_ref, nup_ref):
    """One row tile: embedding_proj + all `max_hop` ACT steps + final LayerNorm."""
    max_hop = pos_ref.shape[0]          # static trip count
    rows, H = y_ref.shape

    # Loop-invariant loads, hoisted once (JAX does not CSE broadcasts in loops).
    we = we_ref[...]                    # (E, H)  bf16  embedding_proj weight
    wf = wf_ref[...]                    # (H, H)  bf16  step-fn weights (MXU operand)
    wp_row = wp_ref[...]                # (1, H)  f32   halting-logit weights
    bf_row = bf_ref[...]                # (1, H)  f32   step-fn bias
    time_rows = time_ref[...]           # (rows, H) f32 timing signal per row
    bp = bp_ref[0]                      # scalar (SMEM) halting-logit bias

    # embedding_proj (Linear, bias=False): bf16 MXU operands, f32 accumulation.
    state0 = jnp.dot(x_ref[...], we, preferred_element_type=jnp.float32)

    zcol = jnp.zeros((rows, 1), jnp.float32)
    carry0 = (state0,                   # running state
              zcol,                     # halting probability
              zcol,                     # remainders
              zcol,                     # n_updates
              jnp.zeros_like(state0))   # previous_state

    def hop(t, carry):
        state, hp, rem, nup, prev = carry
        # state += timing_signal[:, :S, :] + position_signal[:, t, :]
        st = state + time_rows + pos_ref[t]                              # (rows, H)

        # p = sigmoid(Linear(state)) -- f32 VPU multiply + lane reduce.
        logit = jnp.sum(st * wp_row, axis=-1, keepdims=True) + bp        # (rows, 1)
        p = jax.nn.sigmoid(logit)

        # ACT halting-mask algebra (kept in f32 on all chips).
        still = (hp < 1.0).astype(jnp.float32)
        hp_plus = hp + p * still
        new_halted = (hp_plus > THRESHOLD).astype(jnp.float32) * still
        still = (hp_plus <= THRESHOLD).astype(jnp.float32) * still
        hp = hp + p * still
        rem = rem + new_halted * (1.0 - hp)
        hp = hp + new_halted * rem
        nup = nup + still + new_halted
        uw = p * still + new_halted * rem                                # (rows, 1)

        # Step function fn(state) = tanh(state @ Wf + bf).
        # TODO(synk): the real `fn` is a full DecoderLayer (masked self-attn +
        # cross-attn on encoder_output + FFN); a dense tanh layer stands in.
        new_state = jnp.tanh(
            jnp.dot(st.astype(jnp.bfloat16), wf,
                    preferred_element_type=jnp.float32) + bf_row)        # (rows, H)

        prev = prev + uw * (new_state - prev)
        return new_state, hp, rem, nup, prev

    _, _, rem, nup, prev = lax.fori_loop(0, max_hop, hop, carry0, unroll=True)

    # Decoder's final LayerNorm: gamma*(x-mean)/(std+eps)+beta
    # (unbiased std, matching torch.Tensor.std defaults in the custom LayerNorm).
    mean = jnp.mean(prev, axis=-1, keepdims=True)
    diff = prev - mean
    std = jnp.sqrt(jnp.sum(diff * diff, axis=-1, keepdims=True) / (H - 1))
    inv = 1.0 / (std + LN_EPS)
    y_ref[...] = (lng_ref[...] * (diff * inv) + lnb_ref[...]).astype(y_ref.dtype)
    rem_ref[...] = rem
    nup_ref[...] = nup


def decoder_act_forward(inputs, time_enc, pos_enc, max_hop,
                        w_emb, wp, bp, wf, bf, ln_g, ln_b, *, row_tile=None):
    """Pallas implementation of Decoder.forward (universal + ACT, decoding=False).

    TODO(synk): decoding=True attention-weight accumulation, dec_mask
    construction and input_dropout (identity at eval) are outside this kernel.

    inputs    (B, S, E)          token embeddings
    time_enc  (1, >=S, H)        timing signal
    pos_enc   (1, >=max_hop, H)  position (depth) signal
    w_emb     (E, H)             embedding_proj.weight.T  (Linear, bias=False)
    wp, bp    (H, 1), (1,)       halting-unit Linear
    wf, bf    (H, H), (H,)       stand-in step-function weights
    ln_g,ln_b (H,), (H,)         final LayerNorm gamma / beta
    """
    B, S, E = inputs.shape
    H = wf.shape[0]
    R = B * S

    # Row tile for the parallel grid axis (megacore on v7x, bounded VMEM).
    if row_tile is None:
        row_tile = min(R, 256)
    if row_tile != R and (R % row_tile != 0 or row_tile % 8 != 0):
        row_tile = R
    num_tiles = R // row_tile

    # Wrapper-side layout plumbing (all one-off, outside the hot loop).
    x2d = inputs.reshape(R, E).astype(jnp.bfloat16)
    we = w_emb.astype(jnp.bfloat16)
    time_rows = jnp.broadcast_to(time_enc[0, :S, :].astype(jnp.float32)[None],
                                 (B, S, H)).reshape(R, H)
    pos_tab = pos_enc[0, :max_hop, :].astype(jnp.float32).reshape(max_hop, 1, H)
    wp_row = wp.reshape(1, H).astype(jnp.float32)
    bp_s = bp.reshape(1).astype(jnp.float32)
    wf16 = wf.astype(jnp.bfloat16)
    bf_row = bf.reshape(1, H).astype(jnp.float32)
    lng = ln_g.reshape(1, H).astype(jnp.float32)
    lnb = ln_b.reshape(1, H).astype(jnp.float32)

    y, rem, nup = pl.pallas_call(
        decoder_act_kernel,
        out_shape=(jax.ShapeDtypeStruct((R, H), jnp.float32),
                   jax.ShapeDtypeStruct((R, 1), jnp.float32),
                   jax.ShapeDtypeStruct((R, 1), jnp.float32)),
        grid_spec=pltpu.PrefetchScalarGridSpec(
            num_scalar_prefetch=0,
            grid=(num_tiles,),
            in_specs=[
                pl.BlockSpec((row_tile, E), lambda i: (i, 0)),        # x rows (bf16)
                pl.BlockSpec((E, H), lambda i: (0, 0)),               # W_emb (bf16)
                pl.BlockSpec((row_tile, H), lambda i: (i, 0)),        # timing rows
                pl.BlockSpec((max_hop, 1, H), lambda i: (0, 0, 0)),   # position table
                pl.BlockSpec((1, H), lambda i: (0, 0)),               # wp row
                pl.BlockSpec(memory_space=pltpu.MemorySpace.SMEM),    # bp scalar
                pl.BlockSpec((H, H), lambda i: (0, 0)),               # Wf (bf16)
                pl.BlockSpec((1, H), lambda i: (0, 0)),               # bf row
                pl.BlockSpec((1, H), lambda i: (0, 0)),               # LN gamma
                pl.BlockSpec((1, H), lambda i: (0, 0)),               # LN beta
            ],
            out_specs=[
                pl.BlockSpec((row_tile, H), lambda i: (i, 0)),        # y (layer-normed)
                pl.BlockSpec((row_tile, 1), lambda i: (i, 0)),        # remainders
                pl.BlockSpec((row_tile, 1), lambda i: (i, 0)),        # n_updates
            ]),
        compiler_params=pltpu.CompilerParams(
            dimension_semantics=("parallel",),
            vmem_limit_bytes=32 * 1024 * 1024),
    )(x2d, we, time_rows, pos_tab, wp_row, bp_s, wf16, bf_row, lng, lnb)

    return (y.reshape(B, S, H),
            (rem.reshape(B, S), nup.reshape(B, S)))


def decoder_act_reference(inputs, time_enc, pos_enc, max_hop,
                          w_emb, wp, bp, wf, bf, ln_g, ln_b):
    """Pure-JAX reference mirroring the PyTorch forward (decoding=False path).

    Matmuls use the same bf16-operand / f32-accumulation numerics as the
    kernel; halting logit and all ACT mask algebra stay f32.
    """
    B, S, _ = inputs.shape
    H = wf.shape[0]
    st = jnp.einsum('bse,eh->bsh', inputs.astype(jnp.bfloat16),
                    w_emb.astype(jnp.bfloat16),
                    preferred_element_type=jnp.float32)
    hp = jnp.zeros((B, S), jnp.float32)
    rem = jnp.zeros((B, S), jnp.float32)
    nup = jnp.zeros((B, S), jnp.float32)
    prev = jnp.zeros((B, S, H), jnp.float32)
    wf16 = wf.astype(jnp.bfloat16)
    for step in range(max_hop):
        st = st + time_enc[:, :S, :]
        st = st + pos_enc[:, step, :][:, None, :]
        p = jax.nn.sigmoid(
            jnp.einsum('bsh,ho->bs', st, wp,
                       precision=jax.lax.Precision.HIGHEST) + bp[0])
        still = (hp < 1.0).astype(jnp.float32)
        new_halted = (hp + p * still > THRESHOLD).astype(jnp.float32) * still
        still = (hp + p * still <= THRESHOLD).astype(jnp.float32) * still
        hp = hp + p * still
        rem = rem + new_halted * (1.0 - hp)
        hp = hp + new_halted * rem
        nup = nup + still + new_halted
        uw = p * still + new_halted * rem
        st = jnp.tanh(
            jnp.einsum('bsh,hk->bsk', st.astype(jnp.bfloat16), wf16,
                       preferred_element_type=jnp.float32) + bf)
        prev = st * uw[..., None] + prev * (1.0 - uw[..., None])
    mean = prev.mean(-1, keepdims=True)
    diff = prev - mean
    std = jnp.sqrt(jnp.sum(diff * diff, -1, keepdims=True) / (H - 1))
    y = ln_g * diff / (std + LN_EPS) + ln_b
    return y, (rem, nup)


if __name__ == "__main__":
    B, S, H = 2, 8, 32
    E = 32
    MAX_HOP = 6
    S_MAX = 16

    key = jax.random.PRNGKey(0)
    k1, k2, k3, k4, k5, k6, k7, k8 = jax.random.split(key, 8)

    inputs = jax.random.normal(k1, (B, S, E), jnp.float32)
    time_enc = 0.1 * jax.random.normal(k2, (1, S_MAX, H), jnp.float32)
    pos_enc = 0.1 * jax.random.normal(k3, (1, MAX_HOP, H), jnp.float32)

    # embedding_proj = nn.Linear(E, H, bias=False); pass weight.T as (E, H)
    w_emb = (1.0 / jnp.sqrt(E)) * jax.random.normal(k4, (E, H), jnp.float32)
    # p = nn.Linear(H, 1), bias filled with 1 (as in ACT_basic.__init__)
    wp = 0.05 * jax.random.normal(k5, (H, 1), jnp.float32)
    bp = jnp.ones((1,), jnp.float32)
    # deterministic stand-in step function fn: tanh(x @ Wf + bf)
    wf = (1.0 / jnp.sqrt(H)) * jax.random.normal(k6, (H, H), jnp.float32)
    bf = jnp.zeros((H,), jnp.float32)
    # final LayerNorm params (perturbed from identity so the LN path is tested)
    ln_g = 1.0 + 0.1 * jax.random.normal(k7, (H,), jnp.float32)
    ln_b = 0.1 * jax.random.normal(k8, (H,), jnp.float32)

    y, (rem, nup) = decoder_act_forward(inputs, time_enc, pos_enc, MAX_HOP,
                                        w_emb, wp, bp, wf, bf, ln_g, ln_b,
                                        row_tile=8)
    jax.block_until_ready((y, rem, nup))

    y_r, (rem_r, nup_r) = decoder_act_reference(inputs, time_enc, pos_enc,
                                                MAX_HOP, w_emb, wp, bp, wf, bf,
                                                ln_g, ln_b)

    assert jnp.allclose(y, y_r, atol=2e-3, rtol=2e-3), "decoder output mismatch"
    assert jnp.allclose(rem, rem_r, atol=2e-3, rtol=2e-3), "remainders mismatch"
    assert jnp.allclose(nup, nup_r, atol=1e-3), "n_updates mismatch"

    print("KERNEL_OK")
</pallas_src>

<mosaic_0001>
module attributes {stable_mosaic.version = 11 : i64} {
  func.func @decoder_act_kernel(%arg0: i32, %arg1: memref<8x32xbf16, #tpu.memory_space<vmem>>, %arg2: memref<32x32xbf16, #tpu.memory_space<vmem>>, %arg3: memref<8x32xf32, #tpu.memory_space<vmem>>, %arg4: memref<6x1x32xf32, #tpu.memory_space<vmem>>, %arg5: memref<1x32xf32, #tpu.memory_space<vmem>>, %arg6: memref<1xf32, #tpu.memory_space<smem>>, %arg7: memref<32x32xbf16, #tpu.memory_space<vmem>>, %arg8: memref<1x32xf32, #tpu.memory_space<vmem>>, %arg9: memref<1x32xf32, #tpu.memory_space<vmem>>, %arg10: memref<1x32xf32, #tpu.memory_space<vmem>>, %arg11: memref<8x32xf32, #tpu.memory_space<vmem>>, %arg12: memref<8x1xf32, #tpu.memory_space<vmem>>, %arg13: memref<8x1xf32, #tpu.memory_space<vmem>>) attributes {dimension_semantics = [#tpu.dimension_semantics<parallel>], iteration_bounds = array<i64: 2>, scalar_prefetch = 0 : i64, scratch_operands = 0 : i64, tpu.core_type = #tpu.core_type<tc>, window_params = [{transform_indices = @transform_0, window_bounds = array<i64: 8, 32>}, {pipeline_mode = #tpu.pipeline_mode<synchronous>, transform_indices = @transform_1, window_bounds = array<i64: 32, 32>}, {transform_indices = @transform_2, window_bounds = array<i64: 8, 32>}, {pipeline_mode = #tpu.pipeline_mode<synchronous>, transform_indices = @transform_3, window_bounds = array<i64: 6, 1, 32>}, {pipeline_mode = #tpu.pipeline_mode<synchronous>, transform_indices = @transform_4, window_bounds = array<i64: 1, 32>}, {transform_indices = @transform_5, window_bounds = array<i64: 1>}, {pipeline_mode = #tpu.pipeline_mode<synchronous>, transform_indices = @transform_6, window_bounds = array<i64: 32, 32>}, {pipeline_mode = #tpu.pipeline_mode<synchronous>, transform_indices = @transform_7, window_bounds = array<i64: 1, 32>}, {pipeline_mode = #tpu.pipeline_mode<synchronous>, transform_indices = @transform_8, window_bounds = array<i64: 1, 32>}, {pipeline_mode = #tpu.pipeline_mode<synchronous>, transform_indices = @transform_9, window_bounds = array<i64: 1, 32>}, {transform_indices = @transform_10, window_bounds = array<i64: 8, 32>}, {transform_indices = @transform_11, window_bounds = array<i64: 8, 1>}, {transform_indices = @transform_12, window_bounds = array<i64: 8, 1>}]} {
    %c0 = arith.constant 0 : index
    %c0_0 = arith.constant 0 : index
    %0 = vector.load %arg2[%c0, %c0_0] : memref<32x32xbf16, #tpu.memory_space<vmem>>, vector<32x32xbf16>
    %c0_1 = arith.constant 0 : index
    %c0_2 = arith.constant 0 : index
    %1 = vector.load %arg7[%c0_1, %c0_2] : memref<32x32xbf16, #tpu.memory_space<vmem>>, vector<32x32xbf16>
    %c0_3 = arith.constant 0 : index
    %c0_4 = arith.constant 0 : index
    %2 = vector.load %arg5[%c0_3, %c0_4] : memref<1x32xf32, #tpu.memory_space<vmem>>, vector<1x32xf32>
    %c0_5 = arith.constant 0 : index
    %c0_6 = arith.constant 0 : index
    %3 = vector.load %arg8[%c0_5, %c0_6] : memref<1x32xf32, #tpu.memory_space<vmem>>, vector<1x32xf32>
    %c0_7 = arith.constant 0 : index
    %c0_8 = arith.constant 0 : index
    %4 = vector.load %arg3[%c0_7, %c0_8] : memref<8x32xf32, #tpu.memory_space<vmem>>, vector<8x32xf32>
    %c0_9 = arith.constant 0 : index
    %5 = memref.load %arg6[%c0_9] : memref<1xf32, #tpu.memory_space<smem>>
    %c0_10 = arith.constant 0 : index
    %c0_11 = arith.constant 0 : index
    %6 = vector.load %arg1[%c0_10, %c0_11] : memref<8x32xbf16, #tpu.memory_space<vmem>>, vector<8x32xbf16>
    %cst = arith.constant dense<0.000000e+00> : vector<8x32xf32>
    %7 = tpu.matmul %6, %0, %cst {dimension_numbers = #tpu.dot_dimension_numbers<[1], [0], [0], [1], [0, 0, 1, 1], [], []>} : vector<8x32xbf16>, vector<32x32xbf16>, vector<8x32xf32> -> vector<8x32xf32>
    %cst_12 = arith.constant 0.000000e+00 : f32
    %8 = vector.broadcast %cst_12 : f32 to vector<8x1xf32>
    %cst_13 = arith.constant 0.000000e+00 : f32
    %9 = vector.broadcast %cst_13 : f32 to vector<8x32xf32>
    %c0_i32 = arith.constant 0 : i32
    %10 = arith.addf %7, %4 : vector<8x32xf32>
    %11 = arith.index_cast %c0_i32 : i32 to index
    %c0_14 = arith.constant 0 : index
    %c0_15 = arith.constant 0 : index
    %12 = vector.load %arg4[%11, %c0_14, %c0_15] : memref<6x1x32xf32, #tpu.memory_space<vmem>>, vector<1x1x32xf32>
    %13 = vector.shape_cast %12 : vector<1x1x32xf32> to vector<1x32xf32>
    %14 = vector.broadcast %13 : vector<1x32xf32> to vector<8x32xf32>
    %15 = arith.addf %10, %14 : vector<8x32xf32>
    %16 = vector.broadcast %2 : vector<1x32xf32> to vector<8x32xf32>
    %17 = arith.mulf %15, %16 : vector<8x32xf32>
    %cst_16 = arith.constant dense<0.000000e+00> : vector<8xf32>
    %18 = vector.multi_reduction <add>, %17, %cst_16 [1] : vector<8x32xf32> to vector<8xf32>
    %19 = vector.shape_cast %18 : vector<8xf32> to vector<8x1xf32>
    %20 = vector.broadcast %5 : f32 to vector<8x1xf32>
    %21 = arith.addf %19, %20 : vector<8x1xf32>
    %22 = arith.negf %21 : vector<8x1xf32>
    %23 = math.exp %22 : vector<8x1xf32>
    %cst_17 = arith.constant 1.000000e+00 : f32
    %24 = vector.broadcast %cst_17 : f32 to vector<8x1xf32>
    %25 = arith.addf %24, %23 : vector<8x1xf32>
    %26 = arith.divf %24, %25 : vector<8x1xf32>
    %cst_18 = arith.constant 1.000000e+00 : f32
    %27 = vector.broadcast %cst_18 : f32 to vector<8x1xf32>
    %28 = arith.cmpf olt, %8, %27 : vector<8x1xf32>
    %29 = arith.extui %28 : vector<8x1xi1> to vector<8x1xi32>
    %30 = arith.sitofp %29 : vector<8x1xi32> to vector<8x1xf32>
    %31 = arith.mulf %26, %30 : vector<8x1xf32>
    %32 = arith.addf %8, %31 : vector<8x1xf32>
    %cst_19 = arith.constant 0.899999976 : f32
    %33 = vector.broadcast %cst_19 : f32 to vector<8x1xf32>
    %34 = arith.cmpf ogt, %32, %33 : vector<8x1xf32>
    %35 = arith.extui %34 : vector<8x1xi1> to vector<8x1xi32>
    %36 = arith.sitofp %35 : vector<8x1xi32> to vector<8x1xf32>
    %37 = arith.mulf %36, %30 : vector<8x1xf32>
    %cst_20 = arith.constant 0.899999976 : f32
    %38 = vector.broadcast %cst_20 : f32 to vector<8x1xf32>
    %39 = arith.cmpf ole, %32, %38 : vector<8x1xf32>
    %40 = arith.extui %39 : vector<8x1xi1> to vector<8x1xi32>
    %41 = arith.sitofp %40 : vector<8x1xi32> to vector<8x1xf32>
    %42 = arith.mulf %41, %30 : vector<8x1xf32>
    %43 = arith.mulf %26, %42 : vector<8x1xf32>
    %44 = arith.addf %8, %43 : vector<8x1xf32>
    %cst_21 = arith.constant 1.000000e+00 : f32
    %45 = vector.broadcast %cst_21 : f32 to vector<8x1xf32>
    %46 = arith.subf %45, %44 : vector<8x1xf32>
    %47 = arith.mulf %37, %46 : vector<8x1xf32>
    %48 = arith.addf %8, %47 : vector<8x1xf32>
    %49 = arith.mulf %37, %48 : vector<8x1xf32>
    %50 = arith.addf %44, %49 : vector<8x1xf32>
    %51 = arith.addf %8, %42 : vector<8x1xf32>
    %52 = arith.addf %51, %37 : vector<8x1xf32>
    %53 = arith.mulf %26, %42 : vector<8x1xf32>
    %54 = arith.mulf %37, %48 : vector<8x1xf32>
    %55 = arith.addf %53, %54 : vector<8x1xf32>
    %56 = arith.truncf %15 : vector<8x32xf32> to vector<8x32xbf16>
    %cst_22 = arith.constant dense<0.000000e+00> : vector<8x32xf32>
    %57 = tpu.matmul %56, %1, %cst_22 {dimension_numbers = #tpu.dot_dimension_numbers<[1], [0], [0], [1], [0, 0, 1, 1], [], []>} : vector<8x32xbf16>, vector<32x32xbf16>, vector<8x32xf32> -> vector<8x32xf32>
    %58 = vector.broadcast %3 : vector<1x32xf32> to vector<8x32xf32>
    %59 = arith.addf %57, %58 : vector<8x32xf32>
    %60 = math.tanh %59 : vector<8x32xf32>
    %61 = arith.subf %60, %9 : vector<8x32xf32>
    %62 = vector.broadcast %55 : vector<8x1xf32> to vector<8x32xf32>
    %63 = arith.mulf %62, %61 : vector<8x32xf32>
    %64 = arith.addf %9, %63 : vector<8x32xf32>
    %c1_i32 = arith.constant 1 : i32
    %65 = arith.addf %60, %4 : vector<8x32xf32>
    %66 = arith.index_cast %c1_i32 : i32 to index
    %c0_23 = arith.constant 0 : index
    %c0_24 = arith.constant 0 : index
    %67 = vector.load %arg4[%66, %c0_23, %c0_24] : memref<6x1x32xf32, #tpu.memory_space<vmem>>, vector<1x1x32xf32>
    %68 = vector.shape_cast %67 : vector<1x1x32xf32> to vector<1x32xf32>
    %69 = vector.broadcast %68 : vector<1x32xf32> to vector<8x32xf32>
    %70 = arith.addf %65, %69 : vector<8x32xf32>
    %71 = vector.broadcast %2 : vector<1x32xf32> to vector<8x32xf32>
    %72 = arith.mulf %70, %71 : vector<8x32xf32>
    %cst_25 = arith.constant dense<0.000000e+00> : vector<8xf32>
    %73 = vector.multi_reduction <add>, %72, %cst_25 [1] : vector<8x32xf32> to vector<8xf32>
    %74 = vector.shape_cast %73 : vector<8xf32> to vector<8x1xf32>
    %75 = vector.broadcast %5 : f32 to vector<8x1xf32>
    %76 = arith.addf %74, %75 : vector<8x1xf32>
    %77 = arith.negf %76 : vector<8x1xf32>
    %78 = math.exp %77 : vector<8x1xf32>
    %cst_26 = arith.constant 1.000000e+00 : f32
    %79 = vector.broadcast %cst_26 : f32 to vector<8x1xf32>
    %80 = arith.addf %79, %78 : vector<8x1xf32>
    %81 = arith.divf %79, %80 : vector<8x1xf32>
    %cst_27 = arith.constant 1.000000e+00 : f32
    %82 = vector.broadcast %cst_27 : f32 to vector<8x1xf32>
    %83 = arith.cmpf olt, %50, %82 : vector<8x1xf32>
    %84 = arith.extui %83 : vector<8x1xi1> to vector<8x1xi32>
    %85 = arith.sitofp %84 : vector<8x1xi32> to vector<8x1xf32>
    %86 = arith.mulf %81, %85 : vector<8x1xf32>
    %87 = arith.addf %50, %86 : vector<8x1xf32>
    %cst_28 = arith.constant 0.899999976 : f32
    %88 = vector.broadcast %cst_28 : f32 to vector<8x1xf32>
    %89 = arith.cmpf ogt, %87, %88 : vector<8x1xf32>
    %90 = arith.extui %89 : vector<8x1xi1> to vector<8x1xi32>
    %91 = arith.sitofp %90 : vector<8x1xi32> to vector<8x1xf32>
    %92 = arith.mulf %91, %85 : vector<8x1xf32>
    %cst_29 = arith.constant 0.899999976 : f32
    %93 = vector.broadcast %cst_29 : f32 to vector<8x1xf32>
    %94 = arith.cmpf ole, %87, %93 : vector<8x1xf32>
    %95 = arith.extui %94 : vector<8x1xi1> to vector<8x1xi32>
    %96 = arith.sitofp %95 : vector<8x1xi32> to vector<8x1xf32>
    %97 = arith.mulf %96, %85 : vector<8x1xf32>
    %98 = arith.mulf %81, %97 : vector<8x1xf32>
    %99 = arith.addf %50, %98 : vector<8x1xf32>
    %cst_30 = arith.constant 1.000000e+00 : f32
    %100 = vector.broadcast %cst_30 : f32 to vector<8x1xf32>
    %101 = arith.subf %100, %99 : vector<8x1xf32>
    %102 = arith.mulf %92, %101 : vector<8x1xf32>
    %103 = arith.addf %48, %102 : vector<8x1xf32>
    %104 = arith.mulf %92, %103 : vector<8x1xf32>
    %105 = arith.addf %99, %104 : vector<8x1xf32>
    %106 = arith.addf %52, %97 : vector<8x1xf32>
    %107 = arith.addf %106, %92 : vector<8x1xf32>
    %108 = arith.mulf %81, %97 : vector<8x1xf32>
    %109 = arith.mulf %92, %103 : vector<8x1xf32>
    %110 = arith.addf %108, %109 : vector<8x1xf32>
    %111 = arith.truncf %70 : vector<8x32xf32> to vector<8x32xbf16>
    %cst_31 = arith.constant dense<0.000000e+00> : vector<8x32xf32>
    %112 = tpu.matmul %111, %1, %cst_31 {dimension_numbers = #tpu.dot_dimension_numbers<[1], [0], [0], [1], [0, 0, 1, 1], [], []>} : vector<8x32xbf16>, vector<32x32xbf16>, vector<8x32xf32> -> vector<8x32xf32>
    %113 = vector.broadcast %3 : vector<1x32xf32> to vector<8x32xf32>
    %114 = arith.addf %112, %113 : vector<8x32xf32>
    %115 = math.tanh %114 : vector<8x32xf32>
    %116 = arith.subf %115, %64 : vector<8x32xf32>
    %117 = vector.broadcast %110 : vector<8x1xf32> to vector<8x32xf32>
    %118 = arith.mulf %117, %116 : vector<8x32xf32>
    %119 = arith.addf %64, %118 : vector<8x32xf32>
    %c2_i32 = arith.constant 2 : i32
    %120 = arith.addf %115, %4 : vector<8x32xf32>
    %121 = arith.index_cast %c2_i32 : i32 to index
    %c0_32 = arith.constant 0 : index
    %c0_33 = arith.constant 0 : index
    %122 = vector.load %arg4[%121, %c0_32, %c0_33] : memref<6x1x32xf32, #tpu.memory_space<vmem>>, vector<1x1x32xf32>
    %123 = vector.shape_cast %122 : vector<1x1x32xf32> to vector<1x32xf32>
    %124 = vector.broadcast %123 : vector<1x32xf32> to vector<8x32xf32>
    %125 = arith.addf %120, %124 : vector<8x32xf32>
    %126 = vector.broadcast %2 : vector<1x32xf32> to vector<8x32xf32>
    %127 = arith.mulf %125, %126 : vector<8x32xf32>
    %cst_34 = arith.constant dense<0.000000e+00> : vector<8xf32>
    %128 = vector.multi_reduction <add>, %127, %cst_34 [1] : vector<8x32xf32> to vector<8xf32>
    %129 = vector.shape_cast %128 : vector<8xf32> to vector<8x1xf32>
    %130 = vector.broadcast %5 : f32 to vector<8x1xf32>
    %131 = arith.addf %129, %130 : vector<8x1xf32>
    %132 = arith.negf %131 : vector<8x1xf32>
    %133 = math.exp %132 : vector<8x1xf32>
    %cst_35 = arith.constant 1.000000e+00 : f32
    %134 = vector.broadcast %cst_35 : f32 to vector<8x1xf32>
    %135 = arith.addf %134, %133 : vector<8x1xf32>
    %136 = arith.divf %134, %135 : vector<8x1xf32>
    %cst_36 = arith.constant 1.000000e+00 : f32
    %137 = vector.broadcast %cst_36 : f32 to vector<8x1xf32>
    %138 = arith.cmpf olt, %105, %137 : vector<8x1xf32>
    %139 = arith.extui %138 : vector<8x1xi1> to vector<8x1xi32>
    %140 = arith.sitofp %139 : vector<8x1xi32> to vector<8x1xf32>
    %141 = arith.mulf %136, %140 : vector<8x1xf32>
    %142 = arith.addf %105, %141 : vector<8x1xf32>
    %cst_37 = arith.constant 0.899999976 : f32
    %143 = vector.broadcast %cst_37 : f32 to vector<8x1xf32>
    %144 = arith.cmpf ogt, %142, %143 : vector<8x1xf32>
    %145 = arith.extui %144 : vector<8x1xi1> to vector<8x1xi32>
    %146 = arith.sitofp %145 : vector<8x1xi32> to vector<8x1xf32>
    %147 = arith.mulf %146, %140 : vector<8x1xf32>
    %cst_38 = arith.constant 0.899999976 : f32
    %148 = vector.broadcast %cst_38 : f32 to vector<8x1xf32>
    %149 = arith.cmpf ole, %142, %148 : vector<8x1xf32>
    %150 = arith.extui %149 : vector<8x1xi1> to vector<8x1xi32>
    %151 = arith.sitofp %150 : vector<8x1xi32> to vector<8x1xf32>
    %152 = arith.mulf %151, %140 : vector<8x1xf32>
    %153 = arith.mulf %136, %152 : vector<8x1xf32>
    %154 = arith.addf %105, %153 : vector<8x1xf32>
    %cst_39 = arith.constant 1.000000e+00 : f32
    %155 = vector.broadcast %cst_39 : f32 to vector<8x1xf32>
    %156 = arith.subf %155, %154 : vector<8x1xf32>
    %157 = arith.mulf %147, %156 : vector<8x1xf32>
    %158 = arith.addf %103, %157 : vector<8x1xf32>
    %159 = arith.mulf %147, %158 : vector<8x1xf32>
    %160 = arith.addf %154, %159 : vector<8x1xf32>
    %161 = arith.addf %107, %152 : vector<8x1xf32>
    %162 = arith.addf %161, %147 : vector<8x1xf32>
    %163 = arith.mulf %136, %152 : vector<8x1xf32>
    %164 = arith.mulf %147, %158 : vector<8x1xf32>
    %165 = arith.addf %163, %164 : vector<8x1xf32>
    %166 = arith.truncf %125 : vector<8x32xf32> to vector<8x32xbf16>
    %cst_40 = arith.constant dense<0.000000e+00> : vector<8x32xf32>
    %167 = tpu.matmul %166, %1, %cst_40 {dimension_numbers = #tpu.dot_dimension_numbers<[1], [0], [0], [1], [0, 0, 1, 1], [], []>} : vector<8x32xbf16>, vector<32x32xbf16>, vector<8x32xf32> -> vector<8x32xf32>
    %168 = vector.broadcast %3 : vector<1x32xf32> to vector<8x32xf32>
    %169 = arith.addf %167, %168 : vector<8x32xf32>
    %170 = math.tanh %169 : vector<8x32xf32>
    %171 = arith.subf %170, %119 : vector<8x32xf32>
    %172 = vector.broadcast %165 : vector<8x1xf32> to vector<8x32xf32>
    %173 = arith.mulf %172, %171 : vector<8x32xf32>
    %174 = arith.addf %119, %173 : vector<8x32xf32>
    %c3_i32 = arith.constant 3 : i32
    %175 = arith.addf %170, %4 : vector<8x32xf32>
    %176 = arith.index_cast %c3_i32 : i32 to index
    %c0_41 = arith.constant 0 : index
    %c0_42 = arith.constant 0 : index
    %177 = vector.load %arg4[%176, %c0_41, %c0_42] : memref<6x1x32xf32, #tpu.memory_space<vmem>>, vector<1x1x32xf32>
    %178 = vector.shape_cast %177 : vector<1x1x32xf32> to vector<1x32xf32>
    %179 = vector.broadcast %178 : vector<1x32xf32> to vector<8x32xf32>
    %180 = arith.addf %175, %179 : vector<8x32xf32>
    %181 = vector.broadcast %2 : vector<1x32xf32> to vector<8x32xf32>
    %182 = arith.mulf %180, %181 : vector<8x32xf32>
    %cst_43 = arith.constant dense<0.000000e+00> : vector<8xf32>
    %183 = vector.multi_reduction <add>, %182, %cst_43 [1] : vector<8x32xf32> to vector<8xf32>
    %184 = vector.shape_cast %183 : vector<8xf32> to vector<8x1xf32>
    %185 = vector.broadcast %5 : f32 to vector<8x1xf32>
    %186 = arith.addf %184, %185 : vector<8x1xf32>
    %187 = arith.negf %186 : vector<8x1xf32>
    %188 = math.exp %187 : vector<8x1xf32>
    %cst_44 = arith.constant 1.000000e+00 : f32
    %189 = vector.broadcast %cst_44 : f32 to vector<8x1xf32>
    %190 = arith.addf %189, %188 : vector<8x1xf32>
    %191 = arith.divf %189, %190 : vector<8x1xf32>
    %cst_45 = arith.constant 1.000000e+00 : f32
    %192 = vector.broadcast %cst_45 : f32 to vector<8x1xf32>
    %193 = arith.cmpf olt, %160, %192 : vector<8x1xf32>
    %194 = arith.extui %193 : vector<8x1xi1> to vector<8x1xi32>
    %195 = arith.sitofp %194 : vector<8x1xi32> to vector<8x1xf32>
    %196 = arith.mulf %191, %195 : vector<8x1xf32>
    %197 = arith.addf %160, %196 : vector<8x1xf32>
    %cst_46 = arith.constant 0.899999976 : f32
    %198 = vector.broadcast %cst_46 : f32 to vector<8x1xf32>
    %199 = arith.cmpf ogt, %197, %198 : vector<8x1xf32>
    %200 = arith.extui %199 : vector<8x1xi1> to vector<8x1xi32>
    %201 = arith.sitofp %200 : vector<8x1xi32> to vector<8x1xf32>
    %202 = arith.mulf %201, %195 : vector<8x1xf32>
    %cst_47 = arith.constant 0.899999976 : f32
    %203 = vector.broadcast %cst_47 : f32 to vector<8x1xf32>
    %204 = arith.cmpf ole, %197, %203 : vector<8x1xf32>
    %205 = arith.extui %204 : vector<8x1xi1> to vector<8x1xi32>
    %206 = arith.sitofp %205 : vector<8x1xi32> to vector<8x1xf32>
    %207 = arith.mulf %206, %195 : vector<8x1xf32>
    %208 = arith.mulf %191, %207 : vector<8x1xf32>
    %209 = arith.addf %160, %208 : vector<8x1xf32>
    %cst_48 = arith.constant 1.000000e+00 : f32
    %210 = vector.broadcast %cst_48 : f32 to vector<8x1xf32>
    %211 = arith.subf %210, %209 : vector<8x1xf32>
    %212 = arith.mulf %202, %211 : vector<8x1xf32>
    %213 = arith.addf %158, %212 : vector<8x1xf32>
    %214 = arith.mulf %202, %213 : vector<8x1xf32>
    %215 = arith.addf %209, %214 : vector<8x1xf32>
    %216 = arith.addf %162, %207 : vector<8x1xf32>
    %217 = arith.addf %216, %202 : vector<8x1xf32>
    %218 = arith.mulf %191, %207 : vector<8x1xf32>
    %219 = arith.mulf %202, %213 : vector<8x1xf32>
    %220 = arith.addf %218, %219 : vector<8x1xf32>
    %221 = arith.truncf %180 : vector<8x32xf32> to vector<8x32xbf16>
    %cst_49 = arith.constant dense<0.000000e+00> : vector<8x32xf32>
    %222 = tpu.matmul %221, %1, %cst_49 {dimension_numbers = #tpu.dot_dimension_numbers<[1], [0], [0], [1], [0, 0, 1, 1], [], []>} : vector<8x32xbf16>, vector<32x32xbf16>, vector<8x32xf32> -> vector<8x32xf32>
    %223 = vector.broadcast %3 : vector<1x32xf32> to vector<8x32xf32>
    %224 = arith.addf %222, %223 : vector<8x32xf32>
    %225 = math.tanh %224 : vector<8x32xf32>
    %226 = arith.subf %225, %174 : vector<8x32xf32>
    %227 = vector.broadcast %220 : vector<8x1xf32> to vector<8x32xf32>
    %228 = arith.mulf %227, %226 : vector<8x32xf32>
    %229 = arith.addf %174, %228 : vector<8x32xf32>
    %c4_i32 = arith.constant 4 : i32
    %230 = arith.addf %225, %4 : vector<8x32xf32>
    %231 = arith.index_cast %c4_i32 : i32 to index
    %c0_50 = arith.constant 0 : index
    %c0_51 = arith.constant 0 : index
    %232 = vector.load %arg4[%231, %c0_50, %c0_51] : memref<6x1x32xf32, #tpu.memory_space<vmem>>, vector<1x1x32xf32>
    %233 = vector.shape_cast %232 : vector<1x1x32xf32> to vector<1x32xf32>
    %234 = vector.broadcast %233 : vector<1x32xf32> to vector<8x32xf32>
    %235 = arith.addf %230, %234 : vector<8x32xf32>
    %236 = vector.broadcast %2 : vector<1x32xf32> to vector<8x32xf32>
    %237 = arith.mulf %235, %236 : vector<8x32xf32>
    %cst_52 = arith.constant dense<0.000000e+00> : vector<8xf32>
    %238 = vector.multi_reduction <add>, %237, %cst_52 [1] : vector<8x32xf32> to vector<8xf32>
    %239 = vector.shape_cast %238 : vector<8xf32> to vector<8x1xf32>
    %240 = vector.broadcast %5 : f32 to vector<8x1xf32>
    %241 = arith.addf %239, %240 : vector<8x1xf32>
    %242 = arith.negf %241 : vector<8x1xf32>
    %243 = math.exp %242 : vector<8x1xf32>
    %cst_53 = arith.constant 1.000000e+00 : f32
    %244 = vector.broadcast %cst_53 : f32 to vector<8x1xf32>
    %245 = arith.addf %244, %243 : vector<8x1xf32>
    %246 = arith.divf %244, %245 : vector<8x1xf32>
    %cst_54 = arith.constant 1.000000e+00 : f32
    %247 = vector.broadcast %cst_54 : f32 to vector<8x1xf32>
    %248 = arith.cmpf olt, %215, %247 : vector<8x1xf32>
    %249 = arith.extui %248 : vector<8x1xi1> to vector<8x1xi32>
    %250 = arith.sitofp %249 : vector<8x1xi32> to vector<8x1xf32>
    %251 = arith.mulf %246, %250 : vector<8x1xf32>
    %252 = arith.addf %215, %251 : vector<8x1xf32>
    %cst_55 = arith.constant 0.899999976 : f32
    %253 = vector.broadcast %cst_55 : f32 to vector<8x1xf32>
    %254 = arith.cmpf ogt, %252, %253 : vector<8x1xf32>
    %255 = arith.extui %254 : vector<8x1xi1> to vector<8x1xi32>
    %256 = arith.sitofp %255 : vector<8x1xi32> to vector<8x1xf32>
    %257 = arith.mulf %256, %250 : vector<8x1xf32>
    %cst_56 = arith.constant 0.899999976 : f32
    %258 = vector.broadcast %cst_56 : f32 to vector<8x1xf32>
    %259 = arith.cmpf ole, %252, %258 : vector<8x1xf32>
    %260 = arith.extui %259 : vector<8x1xi1> to vector<8x1xi32>
    %261 = arith.sitofp %260 : vector<8x1xi32> to vector<8x1xf32>
    %262 = arith.mulf %261, %250 : vector<8x1xf32>
    %263 = arith.mulf %246, %262 : vector<8x1xf32>
    %264 = arith.addf %215, %263 : vector<8x1xf32>
    %cst_57 = arith.constant 1.000000e+00 : f32
    %265 = vector.broadcast %cst_57 : f32 to vector<8x1xf32>
    %266 = arith.subf %265, %264 : vector<8x1xf32>
    %267 = arith.mulf %257, %266 : vector<8x1xf32>
    %268 = arith.addf %213, %267 : vector<8x1xf32>
    %269 = arith.mulf %257, %268 : vector<8x1xf32>
    %270 = arith.addf %264, %269 : vector<8x1xf32>
    %271 = arith.addf %217, %262 : vector<8x1xf32>
    %272 = arith.addf %271, %257 : vector<8x1xf32>
    %273 = arith.mulf %246, %262 : vector<8x1xf32>
    %274 = arith.mulf %257, %268 : vector<8x1xf32>
    %275 = arith.addf %273, %274 : vector<8x1xf32>
    %276 = arith.truncf %235 : vector<8x32xf32> to vector<8x32xbf16>
    %cst_58 = arith.constant dense<0.000000e+00> : vector<8x32xf32>
    %277 = tpu.matmul %276, %1, %cst_58 {dimension_numbers = #tpu.dot_dimension_numbers<[1], [0], [0], [1], [0, 0, 1, 1], [], []>} : vector<8x32xbf16>, vector<32x32xbf16>, vector<8x32xf32> -> vector<8x32xf32>
    %278 = vector.broadcast %3 : vector<1x32xf32> to vector<8x32xf32>
    %279 = arith.addf %277, %278 : vector<8x32xf32>
    %280 = math.tanh %279 : vector<8x32xf32>
    %281 = arith.subf %280, %229 : vector<8x32xf32>
    %282 = vector.broadcast %275 : vector<8x1xf32> to vector<8x32xf32>
    %283 = arith.mulf %282, %281 : vector<8x32xf32>
    %284 = arith.addf %229, %283 : vector<8x32xf32>
    %c5_i32 = arith.constant 5 : i32
    %285 = arith.addf %280, %4 : vector<8x32xf32>
    %286 = arith.index_cast %c5_i32 : i32 to index
    %c0_59 = arith.constant 0 : index
    %c0_60 = arith.constant 0 : index
    %287 = vector.load %arg4[%286, %c0_59, %c0_60] : memref<6x1x32xf32, #tpu.memory_space<vmem>>, vector<1x1x32xf32>
    %288 = vector.shape_cast %287 : vector<1x1x32xf32> to vector<1x32xf32>
    %289 = vector.broadcast %288 : vector<1x32xf32> to vector<8x32xf32>
    %290 = arith.addf %285, %289 : vector<8x32xf32>
    %291 = vector.broadcast %2 : vector<1x32xf32> to vector<8x32xf32>
    %292 = arith.mulf %290, %291 : vector<8x32xf32>
    %cst_61 = arith.constant dense<0.000000e+00> : vector<8xf32>
    %293 = vector.multi_reduction <add>, %292, %cst_61 [1] : vector<8x32xf32> to vector<8xf32>
    %294 = vector.shape_cast %293 : vector<8xf32> to vector<8x1xf32>
    %295 = vector.broadcast %5 : f32 to vector<8x1xf32>
    %296 = arith.addf %294, %295 : vector<8x1xf32>
    %297 = arith.negf %296 : vector<8x1xf32>
    %298 = math.exp %297 : vector<8x1xf32>
    %cst_62 = arith.constant 1.000000e+00 : f32
    %299 = vector.broadcast %cst_62 : f32 to vector<8x1xf32>
    %300 = arith.addf %299, %298 : vector<8x1xf32>
    %301 = arith.divf %299, %300 : vector<8x1xf32>
    %cst_63 = arith.constant 1.000000e+00 : f32
    %302 = vector.broadcast %cst_63 : f32 to vector<8x1xf32>
    %303 = arith.cmpf olt, %270, %302 : vector<8x1xf32>
    %304 = arith.extui %303 : vector<8x1xi1> to vector<8x1xi32>
    %305 = arith.sitofp %304 : vector<8x1xi32> to vector<8x1xf32>
    %306 = arith.mulf %301, %305 : vector<8x1xf32>
    %307 = arith.addf %270, %306 : vector<8x1xf32>
    %cst_64 = arith.constant 0.899999976 : f32
    %308 = vector.broadcast %cst_64 : f32 to vector<8x1xf32>
    %309 = arith.cmpf ogt, %307, %308 : vector<8x1xf32>
    %310 = arith.extui %309 : vector<8x1xi1> to vector<8x1xi32>
    %311 = arith.sitofp %310 : vector<8x1xi32> to vector<8x1xf32>
    %312 = arith.mulf %311, %305 : vector<8x1xf32>
    %cst_65 = arith.constant 0.899999976 : f32
    %313 = vector.broadcast %cst_65 : f32 to vector<8x1xf32>
    %314 = arith.cmpf ole, %307, %313 : vector<8x1xf32>
    %315 = arith.extui %314 : vector<8x1xi1> to vector<8x1xi32>
    %316 = arith.sitofp %315 : vector<8x1xi32> to vector<8x1xf32>
    %317 = arith.mulf %316, %305 : vector<8x1xf32>
    %318 = arith.mulf %301, %317 : vector<8x1xf32>
    %319 = arith.addf %270, %318 : vector<8x1xf32>
    %cst_66 = arith.constant 1.000000e+00 : f32
    %320 = vector.broadcast %cst_66 : f32 to vector<8x1xf32>
    %321 = arith.subf %320, %319 : vector<8x1xf32>
    %322 = arith.mulf %312, %321 : vector<8x1xf32>
    %323 = arith.addf %268, %322 : vector<8x1xf32>
    %324 = arith.mulf %312, %323 : vector<8x1xf32>
    %325 = arith.addf %319, %324 : vector<8x1xf32>
    %326 = arith.addf %272, %317 : vector<8x1xf32>
    %327 = arith.addf %326, %312 : vector<8x1xf32>
    %328 = arith.mulf %301, %317 : vector<8x1xf32>
    %329 = arith.mulf %312, %323 : vector<8x1xf32>
    %330 = arith.addf %328, %329 : vector<8x1xf32>
    %331 = arith.truncf %290 : vector<8x32xf32> to vector<8x32xbf16>
    %cst_67 = arith.constant dense<0.000000e+00> : vector<8x32xf32>
    %332 = tpu.matmul %331, %1, %cst_67 {dimension_numbers = #tpu.dot_dimension_numbers<[1], [0], [0], [1], [0, 0, 1, 1], [], []>} : vector<8x32xbf16>, vector<32x32xbf16>, vector<8x32xf32> -> vector<8x32xf32>
    %333 = vector.broadcast %3 : vector<1x32xf32> to vector<8x32xf32>
    %334 = arith.addf %332, %333 : vector<8x32xf32>
    %335 = math.tanh %334 : vector<8x32xf32>
    %336 = arith.subf %335, %284 : vector<8x32xf32>
    %337 = vector.broadcast %330 : vector<8x1xf32> to vector<8x32xf32>
    %338 = arith.mulf %337, %336 : vector<8x32xf32>
    %339 = arith.addf %284, %338 : vector<8x32xf32>
    %c6_i32 = arith.constant 6 : i32
    %cst_68 = arith.constant dense<0.000000e+00> : vector<8xf32>
    %340 = vector.multi_reduction <add>, %339, %cst_68 [1] : vector<8x32xf32> to vector<8xf32>
    %341 = vector.shape_cast %340 : vector<8xf32> to vector<8x1xf32>
    %cst_69 = arith.constant 3.200000e+01 : f32
    %342 = vector.broadcast %cst_69 : f32 to vector<8x1xf32>
    %343 = arith.divf %341, %342 : vector<8x1xf32>
    %344 = vector.broadcast %343 : vector<8x1xf32> to vector<8x32xf32>
    %345 = arith.subf %339, %344 : vector<8x32xf32>
    %346 = arith.mulf %345, %345 : vector<8x32xf32>
    %cst_70 = arith.constant dense<0.000000e+00> : vector<8xf32>
    %347 = vector.multi_reduction <add>, %346, %cst_70 [1] : vector<8x32xf32> to vector<8xf32>
    %348 = vector.shape_cast %347 : vector<8xf32> to vector<8x1xf32>
    %cst_71 = arith.constant 3.100000e+01 : f32
    %349 = vector.broadcast %cst_71 : f32 to vector<8x1xf32>
    %350 = arith.divf %348, %349 : vector<8x1xf32>
    %351 = math.sqrt %350 : vector<8x1xf32>
    %cst_72 = arith.constant 9.99999997E-7 : f32
    %352 = vector.broadcast %cst_72 : f32 to vector<8x1xf32>
    %353 = arith.addf %351, %352 : vector<8x1xf32>
    %cst_73 = arith.constant 1.000000e+00 : f32
    %354 = vector.broadcast %cst_73 : f32 to vector<8x1xf32>
    %355 = arith.divf %354, %353 : vector<8x1xf32>
    %c0_74 = arith.constant 0 : index
    %c0_75 = arith.constant 0 : index
    %356 = vector.load %arg9[%c0_74, %c0_75] : memref<1x32xf32, #tpu.memory_space<vmem>>, vector<1x32xf32>
    %357 = vector.broadcast %355 : vector<8x1xf32> to vector<8x32xf32>
    %358 = arith.mulf %345, %357 : vector<8x32xf32>
    %359 = vector.broadcast %356 : vector<1x32xf32> to vector<8x32xf32>
    %360 = arith.mulf %359, %358 : vector<8x32xf32>
    %c0_76 = arith.constant 0 : index
    %c0_77 = arith.constant 0 : index
    %361 = vector.load %arg10[%c0_76, %c0_77] : memref<1x32xf32, #tpu.memory_space<vmem>>, vector<1x32xf32>
    %362 = vector.broadcast %361 : vector<1x32xf32> to vector<8x32xf32>
    %363 = arith.addf %360, %362 : vector<8x32xf32>
    %c0_78 = arith.constant 0 : index
    %c0_79 = arith.constant 0 : index
    %364 = vector.load %arg11[%c0_78, %c0_79] : memref<8x32xf32, #tpu.memory_space<vmem>>, vector<8x32xf32>
    tpu.vector_store %arg11[%c0_78, %c0_79], %363 {strides = array<i32>} : memref<8x32xf32, #tpu.memory_space<vmem>>, vector<8x32xf32>,
    %c0_80 = arith.constant 0 : index
    %c0_81 = arith.constant 0 : index
    %365 = vector.load %arg12[%c0_80, %c0_81] : memref<8x1xf32, #tpu.memory_space<vmem>>, vector<8x1xf32>
    tpu.vector_store %arg12[%c0_80, %c0_81], %323 {strides = array<i32>} : memref<8x1xf32, #tpu.memory_space<vmem>>, vector<8x1xf32>,
    %c0_82 = arith.constant 0 : index
    %c0_83 = arith.constant 0 : index
    %366 = vector.load %arg13[%c0_82, %c0_83] : memref<8x1xf32, #tpu.memory_space<vmem>>, vector<8x1xf32>
    tpu.vector_store %arg13[%c0_82, %c0_83], %327 {strides = array<i32>} : memref<8x1xf32, #tpu.memory_space<vmem>>, vector<8x1xf32>,
    return
  }
  func.func @transform_0(%arg0: i32) -> (i32, i32) {
    %c0_i32 = arith.constant 0 : i32
    %c0_i32_0 = arith.constant 0 : i32
    return %arg0, %c0_i32 : i32, i32
  }
  func.func @transform_1(%arg0: i32) -> (i32, i32) {
    %c0_i32 = arith.constant 0 : i32
    %c0_i32_0 = arith.constant 0 : i32
    %c0_i32_1 = arith.constant 0 : i32
    return %c0_i32, %c0_i32_0 : i32, i32
  }
  func.func @transform_2(%arg0: i32) -> (i32, i32) {
    %c0_i32 = arith.constant 0 : i32
    %c0_i32_0 = arith.constant 0 : i32
    return %arg0, %c0_i32 : i32, i32
  }
  func.func @transform_3(%arg0: i32) -> (i32, i32, i32) {
    %c0_i32 = arith.constant 0 : i32
    %c0_i32_0 = arith.constant 0 : i32
    %c0_i32_1 = arith.constant 0 : i32
    %c0_i32_2 = arith.constant 0 : i32
    return %c0_i32, %c0_i32_0, %c0_i32_1 : i32, i32, i32
  }
  func.func @transform_4(%arg0: i32) -> (i32, i32) {
    %c0_i32 = arith.constant 0 : i32
    %c0_i32_0 = arith.constant 0 : i32
    %c0_i32_1 = arith.constant 0 : i32
    return %c0_i32, %c0_i32_0 : i32, i32
  }
  func.func @transform_5(%arg0: i32) -> i32 {
    %c0_i32 = arith.constant 0 : i32
    %c0_i32_0 = arith.constant 0 : i32
    return %c0_i32 : i32
  }
  func.func @transform_6(%arg0: i32) -> (i32, i32) {
    %c0_i32 = arith.constant 0 : i32
    %c0_i32_0 = arith.constant 0 : i32
    %c0_i32_1 = arith.constant 0 : i32
    return %c0_i32, %c0_i32_0 : i32, i32
  }
  func.func @transform_7(%arg0: i32) -> (i32, i32) {
    %c0_i32 = arith.constant 0 : i32
    %c0_i32_0 = arith.constant 0 : i32
    %c0_i32_1 = arith.constant 0 : i32
    return %c0_i32, %c0_i32_0 : i32, i32
  }
  func.func @transform_8(%arg0: i32) -> (i32, i32) {
    %c0_i32 = arith.constant 0 : i32
    %c0_i32_0 = arith.constant 0 : i32
    %c0_i32_1 = arith.constant 0 : i32
    return %c0_i32, %c0_i32_0 : i32, i32
  }
  func.func @transform_9(%arg0: i32) -> (i32, i32) {
    %c0_i32 = arith.constant 0 : i32
    %c0_i32_0 = arith.constant 0 : i32
    %c0_i32_1 = arith.constant 0 : i32
    return %c0_i32, %c0_i32_0 : i32, i32
  }
  func.func @transform_10(%arg0: i32) -> (i32, i32) {
    %c0_i32 = arith.constant 0 : i32
    %c0_i32_0 = arith.constant 0 : i32
    return %arg0, %c0_i32 : i32, i32
  }
  func.func @transform_11(%arg0: i32) -> (i32, i32) {
    %c0_i32 = arith.constant 0 : i32
    %c0_i32_0 = arith.constant 0 : i32
    return %arg0, %c0_i32 : i32, i32
  }
  func.func @transform_12(%arg0: i32) -> (i32, i32) {
    %c0_i32 = arith.constant 0 : i32
    %c0_i32_0 = arith.constant 0 : i32
    return %arg0, %c0_i32 : i32, i32
  }
}

</mosaic_0001>

<bundles_post_ra>
// kernel: tpu_custom_call.1
= control target key start
LH: loop header
LB: loop body
LE: loop exit
PB: predicated region body
PF: predicated region fallthrough
CT: control target
= control target key end

     0   :  { %s2361_s0 = inlined_call_operand.hbm [shape: bf16[16,32], index: 0, kind: input, shape index: {}]   ;;  %s2362_s1 = inlined_call_operand.hbm [shape: bf16[32,32], index: 1, kind: input, shape index: {}]   ;;  %s2363_s2 = inlined_call_operand.hbm [shape: f32[16,32], index: 2, kind: input, shape index: {}]   ;;  %s2364_s3 = inlined_call_operand.vmem [shape: f32[6,1,32], index: 3, kind: input, shape index: {}]   ;;  %s2365_s4 = inlined_call_operand.hbm [shape: f32[1,32], index: 4, kind: input, shape index: {}]   ;;  %s2366_s5 = inlined_call_operand.<no memory space> [shape: f32[1], index: 5, kind: input, shape index: {}]   ;;  %s2367_s6 = inlined_call_operand.vmem [shape: bf16[32,32], index: 6, kind: input, shape index: {}]   ;;  %s2368_s7 = inlined_call_operand.vmem [shape: f32[1,32], index: 7, kind: input, shape index: {}]   ;;  %s2369_s8 = inlined_call_operand.vmem [shape: f32[1,32], index: 8, kind: input, shape index: {}]   ;;  %s2370_s9 = inlined_call_operand.vmem [shape: f32[1,32], index: 9, kind: input, shape index: {}]   ;;  %s2371_s10 = inlined_call_operand.hbm [shape: f32[16,32], index: 10, kind: output, shape index: {0}]   ;;  %s2372_s11 = inlined_call_operand.vmem [shape: f32[16,1], index: 11, kind: output, shape index: {1}]   ;;  %s2373_s12 = inlined_call_operand.vmem [shape: f32[16,1], index: 12, kind: output, shape index: {2}]  }
   0x1   :  { %2387 = sst [smem:[#allocation19_spill]] %s2362_s1 }
   0x2   :  { %2388 = sst [smem:[#allocation20_spill]] %s2369_s8 }
   0x3   :  { %2389 = sst [smem:[#allocation21_spill]] %s2370_s9 }
   0x4   :  { %2390 = sst [smem:[#allocation22_spill]] %s2371_s10 }
   0x5   :  { %18 = sst [smem:[#allocation2]] %s2366_s5 }
   0x6   :  { %19 = vsyncpa [#allocation4], 0 }
   0x7   :  { %21 = vsyncpa [#allocation4 + $0x1], 0 }
   0x8   :  { %22 = vsyncpa [#allocation7], 0 }
   0x9   :  { %23 = vsyncpa [#allocation5], 0 }
   0xa   :  { %25 = vsyncpa [#allocation5 + $0x1], 0  ;;  %s1923_s23 = smov 0   ;;  %s1925_s24 = smov 0  }
   0xb   :  { %s1927_s25 = smov 0   ;;  %s1929_s26 = smov 0  }
   0xc LB: > { %2391 = sst [smem:[#allocation16_spill]] %s1832_s23  ;;  %s1944_s5 = sadd.s32 4294967295, %s1844_s26   ;;  %s1844_s26 = sphi %s1929_s26, %s2421_s26   ;;  %s1840_s25 = sphi %s1927_s25, %s2424_s25   ;;  %s1836_s24 = sphi %s1925_s24, %s2423_s24   ;;  %s1832_s23 = sphi %s1923_s23, %s2422_s23  }
   0xd   : > { %s1383_s27 = sadd.s32 4294967294, %s1844_s26   ;;  %p51_p0 = scmp.ne.s32.totalorder %s1836_s24, %s1832_s23 }
   0xe   : > { %p2375_p1 = scmp.eq.s32.totalorder %s1944_s5, 0  ;;  %p275_p3 = scmp.eq.s32.totalorder %s1383_s27, 1 }
   0xf   : > { %p1384_p5 = scmp.ge.s32.totalorder %s1844_s26, 1  ;;  %p334_p7 = scmp.lt.s32.totalorder %s1844_s26, 3 }
  0x10   : > { %p1953_p4 = por %p2375_p1, %p51_p0  ;;  %p1958_p6 = por %p275_p3, %p51_p0 }
  0x11   : > { %p1963_p8 = pnand %p1384_p5, %p334_p7  ;;  %s1846_s13 = smov [#allocation6]  }
  0x12   : > { %s2392_s28 = scalar_select %p1953_p4, 1, 0 }
  0x13   : > { %s2393_s29 = scalar_select %p1958_p6, 1, 0 }
  0x14   : > { %s2395_s30 = scalar_select %p1963_p8, 1, 0 }
  0x15   : > { %2394 = sst [smem:[#allocation17_spill]] %s2393_s29  ;;  %s346_s14 = sshll.u32 %s1846_s13, 4  ;;  %s1967_s14 = int_to_ptr.vmem [resolvable:$true] %s346_s14 }
  0x16   : > { %p1544_p9 = pneg %p1963_p8  ;;  %s1979_s16 = sadd.s32 1, %s1844_s26  }
  0x17   : > { %2397 = sst [smem:[#allocation18_spill]] %s1979_s16  ;;  %s38_s17 = sadd.s32 1, %s1840_s25 }
  0x18   : > { %p1974_p11 = pnand %p1544_p9, %p2375_p1  ;;  %s35_s18 = ssub.s32 %s1844_s26, %s1979_s16 }
  0x19   : > { %s2398_s1 = sld [smem:[#allocation19_spill]] }
  0x1a   : > { %p2380_p13 = pneg %p1974_p11 }
  0x1f   : > { %s1650_s21 = scalar_lea.hbm %s2398_s1, 256 }
  0x20   : > { %p1651_p12 = scmp.ne.s32.totalorder %s2398_s1, %s1650_s21  ;;  %p1657_p5 = scmp.lt.u32.totalorder %s1650_s21, %s2398_s1 }
  0x22   : > { %p1653_p0 = pnand %p2380_p13, %p1651_p12 }
  0x24   : > { %p1654_p3 = pneg %p1653_p0 }
  0x26   : > { %p1659_p7 = pnand %p1657_p5, %p1654_p3 }
  0x28   : > { %1662 = shalt.err (!%p1659_p7)
}
  0x29   : > { %s1663_s19 = scalar_lea.vmem %s1967_s14, 256  ;;  %p1671_p2 = scmp.lt.s32.totalorder %s1967_s14, %s1967_s14 }
  0x2a   : > { %p1664_p9 = scmp.ne.s32.totalorder %s1967_s14, %s1663_s19  ;;  %p1672_p12 = scmp.lt.s32.totalorder %s1663_s19, %s1663_s19 }
  0x2c   : > { %p1666_p10 = pnand %p1664_p9, %p2380_p13  ;;  %p1673_p0 = por %p1672_p12, %p1671_p2 }
  0x2e   : > { %p1667_p1 = pneg %p1666_p10 }
  0x30   : > { %p1674_p6 = pnand %p1673_p0, %p1667_p1 }
  0x32   : > { %1677 = shalt.err (!%p1674_p6)
}
  0x33   : > { %s1847_s29 = smov 64   ;;  %s1848_s20 = smov 4  }
  0x34   : > { %1547 = dma.hbm_to_vmem [thread:$0]  (!%p1974_p11), %s2398_s1, 256, %s1967_s14, [#allocation7], %s1847_s29, %s1847_s29, %s1848_s20  }
  0x35   : > { %p36_p1 = scmp.eq.s32.totalorder %s35_s18, 0  ;;  %p45_p2 = scmp.ne.s32.totalorder %s1840_s25, %s1836_s24 }
  0x36   : > { %p46_p6 = scmp.eq.s32.totalorder %s1844_s26, 0  ;;  %p1564_p10 = scmp.lt.s32.totalorder %s1844_s26, 2 }
  0x37   : > { %s2016_s27 = scalar_select %p36_p1, %s1840_s25, %s38_s17  }
  0x38   : > { %p47_p3 = por %p46_p6, %p45_p2  ;;  %p2399_p5 = scmp.eq.s32.totalorder %s1944_s5, 1 }
  0x39   : > { %s389_s19 = sand.u32 1, %s1844_s26   ;;  %s391_s16 = sand.u32 1, %s1840_s25  }
  0x3a   : > { %p2020_p7 = por %p2399_p5, %p45_p2  ;;  %s1388_s23 = sshll.u32 %s391_s16, 2 }
  0x3b   : > { %s1389_s10 = sshll.u32 %s1844_s26, 6  ;;  %s393_s17 = scalar_lea.vmem [#allocation3], %s1388_s23 }
  0x3c   : > { %s2400_s13 = scalar_select %p2020_p7, 1, 0 }
  0x3d   : > { %s2030_s14 = scalar_lea.hbm %s2361_s0, %s1389_s10  ;;  %s400_s18 = sshll.u32 %s393_s17, 4  ;;  %s2032_s18 = int_to_ptr.vmem [resolvable:$true] %s400_s18 }
  0x3e   : > { %p2034_p9 = pnand %p1564_p10, %p47_p3  ;;  %s2038_s20 = sshll.u32 %s391_s16, 3 }
  0x3f   : > { %s1849_s21 = smov [#allocation9]   ;;  %s2042_s9 = scalar_lea.sflag [#allocation4], %s389_s19 }
  0x40   : > { %s2401_s29 = scalar_select %p2034_p9, 1, 0 }
  0x41   : > { %s2040_s8 = sshll.u32 %s1849_s21, 4  ;;  %s1678_s10 = scalar_lea.hbm %s2030_s14, 64  ;;  %s364_s8 = int_to_ptr.vmem [resolvable:$true] %s2040_s8 }
  0x42   : > { %p1679_p12 = scmp.ne.s32.totalorder %s2030_s14, %s1678_s10  ;;  %p2384_p0 = pneg %p2034_p9 }
  0x43   : > { %s1683_s17 = scalar_lea.hbm %s2361_s0, 128  ;;  %p1684_p6 = scmp.lt.u32.totalorder %s2030_s14, %s2361_s0 }
  0x44   : > { %p1681_p1 = pnand %p2384_p0, %p1679_p12  ;;  %p1685_p10 = scmp.lt.u32.totalorder %s1683_s17, %s1678_s10 }
  0x45   : > { %p1687_p5 = scmp.lt.u32.totalorder %s1678_s10, %s2030_s14 }
  0x46   : > { %p1682_p2 = pneg %p1681_p1  ;;  %p1686_p3 = por %p1685_p10, %p1684_p6 }
  0x48   : > { %p1688_p13 = por %p1687_p5, %p1686_p3 }
  0x4a   : > { %p1689_p7 = pnand %p1688_p13, %p1682_p2 }
  0x4c   : > { %1692 = shalt.err (!%p1689_p7)
}
  0x4d   : > { %s1693_s19 = scalar_lea.vmem %s2032_s18, 64  ;;  %s1850_s21 = smov [#allocation3]  }
  0x4e   : > { %p1694_p12 = scmp.ne.s32.totalorder %s2032_s18, %s1693_s19  ;;  %s1698_s23 = sshll.u32 %s1850_s21, 4  ;;  %s1699_s23 = int_to_ptr.vmem [resolvable:$false] %s1698_s23 }
  0x4f   : > { %s1700_s1 = scalar_lea.vmem %s1699_s23, 128  ;;  %p1701_p8 = scmp.lt.s32.totalorder %s2032_s18, %s1699_s23 }
  0x50   : > { %p1696_p1 = pnand %p1694_p12, %p2384_p0  ;;  %p1702_p6 = scmp.lt.s32.totalorder %s1700_s1, %s1693_s19 }
  0x52   : > { %p1697_p4 = pneg %p1696_p1  ;;  %p1703_p10 = por %p1702_p6, %p1701_p8 }
  0x54   : > { %p1704_p3 = pnand %p1703_p10, %p1697_p4 }
  0x56   : > { %1707 = shalt.err (!%p1704_p3)
}
  0x57   : > { %1554 = dma.hbm_to_vmem [thread:$0]  (!%p2034_p9), %s2030_s14, 64, %s2032_s18, %s2042_s9  }
  0x58   : > { %s1708_s17 = scalar_lea.hbm %s2365_s4, 16  ;;  %p2402_p4 = pneg %p1974_p11 }
  0x59   : > { %p1709_p13 = scmp.ne.s32.totalorder %s2365_s4, %s1708_s17  ;;  %p1715_p2 = scmp.lt.u32.totalorder %s1708_s17, %s2365_s4 }
  0x5b   : > { %p1711_p8 = pnand %p1709_p13, %p2402_p4 }
  0x5d   : > { %p1712_p7 = pneg %p1711_p8 }
  0x5f   : > { %p1717_p5 = pnand %p1715_p2, %p1712_p7 }
  0x61   : > { %1720 = shalt.err (!%p1717_p5)
}
  0x62   : > { %s1721_s14 = scalar_lea.vmem %s364_s8, 16  ;;  %p2403_p1 = pmov %p2402_p4 }
  0x63   : > { %p1722_p12 = scmp.ne.s32.totalorder %s364_s8, %s1721_s14  ;;  %s1728_s18 = scalar_lea.vmem %s364_s8, 32 }
  0x64   : > { %p1729_p3 = scmp.lt.s32.totalorder %s364_s8, %s364_s8  ;;  %p1730_p0 = scmp.lt.s32.totalorder %s1728_s18, %s1721_s14 }
  0x65   : > { %p1724_p6 = pnand %p1722_p12, %p2403_p1 }
  0x66   : > { %p1731_p9 = por %p1730_p0, %p1729_p3 }
  0x67   : > { %p1725_p10 = pneg %p1724_p6 }
  0x69   : > { %p1732_p4 = pnand %p1731_p9, %p1725_p10 }
  0x6b   : > { %1735 = shalt.err (!%p1732_p4)
}
  0x6c   : > { %1550 = dma.hbm_to_vmem [thread:$0]  (!%p1974_p11), %s2365_s4, 16, %s364_s8, [#allocation7]  }
  0x6d   : > { %s1391_s22 = sshll.u32 %s1844_s26, 7  ;;  %s411_s17 = scalar_lea.vmem [#allocation8], %s2038_s20 }
  0x6e   : > { %s418_s16 = sshll.u32 %s411_s17, 4  ;;  %s416_s23 = scalar_lea.hbm %s2363_s2, %s1391_s22  ;;  %s419_s16 = int_to_ptr.vmem [resolvable:$true] %s418_s16 }
  0x6f   : > { %s1736_s14 = scalar_lea.hbm %s416_s23, 128  ;;  %p2404_p0 = scmp.ne.s32.totalorder %s2401_s29, 0 }
  0x70   : > { %p1737_p9 = scmp.ne.s32.totalorder %s416_s23, %s1736_s14  ;;  %s1741_s1 = scalar_lea.hbm %s2363_s2, 256 }
  0x71   : > { %p2405_p13 = pneg %p2404_p0  ;;  %p1742_p11 = scmp.lt.u32.totalorder %s416_s23, %s2363_s2 }
  0x72   : > { %p1743_p2 = scmp.lt.u32.totalorder %s1741_s1, %s1736_s14  ;;  %p1745_p12 = scmp.lt.u32.totalorder %s1736_s14, %s416_s23 }
  0x73   : > { %p1739_p8 = pnand %p1737_p9, %p2405_p13 }
  0x74   : > { %p1744_p5 = por %p1743_p2, %p1742_p11 }
  0x75   : > { %p1740_p7 = pneg %p1739_p8 }
  0x76   : > { %p1746_p1 = por %p1745_p12, %p1744_p5 }
  0x78   : > { %p1747_p6 = pnand %p1746_p1, %p1740_p7 }
  0x7a   : > { %1750 = shalt.err (!%p1747_p6)
}
  0x7b   : > { %s1751_s20 = scalar_lea.vmem %s419_s16, 128  ;;  %p2406_p3 = pmov %p2405_p13 }
  0x7c   : > { %p1752_p10 = scmp.ne.s32.totalorder %s419_s16, %s1751_s20  ;;  %s1851_s22 = smov [#allocation8]  }
  0x7d   : > { %s1756_s17 = sshll.u32 %s1851_s22, 4  ;;  %s1757_s17 = int_to_ptr.vmem [resolvable:$false] %s1756_s17 }
  0x7e   : > { %p1754_p4 = pnand %p1752_p10, %p2406_p3  ;;  %s1758_s21 = scalar_lea.vmem %s1757_s17, 256 }
  0x7f   : > { %p1759_p13 = scmp.lt.s32.totalorder %s419_s16, %s1757_s17  ;;  %p1760_p8 = scmp.lt.s32.totalorder %s1758_s21, %s1751_s20 }
  0x80   : > { %p1755_p9 = pneg %p1754_p4 }
  0x81   : > { %p1761_p2 = por %p1760_p8, %p1759_p13 }
  0x83   : > { %p1762_p11 = pnand %p1761_p2, %p1755_p9 }
  0x85   : > { %1765 = shalt.err (!%p1762_p11)
}
  0x86   : > { %1557 = dma.hbm_to_vmem [thread:$0]  (!%p2404_p0), %s416_s23, 128, %s419_s16, %s2042_s9  }
  0x87   : > { %p2407_p7 = scmp.ne.s32.totalorder %s2395_s30, 0 }
  0x88   : > { %s429_s19 = sand.u32 (!%p2407_p7), 1, %s1944_s5   ;;  %s2115_s14 = sand.u32 (!%p2407_p7), 1, %s1836_s24  }
  0x89   : > { %427 = sbr.rel (%p2407_p7) target bundleno = 2110 (0x83e), region = 60  ;;  %s1393_s15 = sshll.u32 (!%p2407_p7), %s2115_s14, 2 }
  0x8a   : > { %s430_s18 = scalar_lea.sflag (!%p2407_p7), [#allocation4], %s429_s19  ;;  %s433_s1 = scalar_lea.vmem (!%p2407_p7), [#allocation3], %s1393_s15 }
  0x8b   : > { %p2408_p5 = scmp.ne.s32.totalorder (!%p2407_p7), %s2392_s28, 0 }
  0x90   : > { %1811 = dma.done.wait (%p2408_p5), %s430_s18, 64  }
  0x91   : > { %1813 = vsyncadd (%p2408_p5), %s430_s18, 4294967232  ;;  %p2409_p0 = scmp.eq.s32.totalorder %s1944_s5, 0 }
  0x93   : > { %1815 = dma.done.wait (%p2409_p0), [#allocation7], 256   ;;  %p2410_p12 = pmov %p2409_p0 }
  0x94   : > { %s1395_s30 = sshll.u32 %s2115_s14, 3 }
  0x95   : > { %1817 = vsyncadd (%p2410_p12), [#allocation7], 4294967040  ;;  %s2129_s29 = scalar_lea.vmem [#allocation8], %s1395_s30 }
  0x96   : > { %1819 = dma.done.wait (%p2408_p5), %s430_s18, 128  }
  0x97   : > { %1821 = vsyncadd (%p2408_p5), %s430_s18, 4294967168  ;;  %p2411_p1 = pmov %p2409_p0 }
  0x98   : > { %p2412_p6 = pmov %p2409_p0 }
  0x99   : > { %1823 = dma.done.wait (%p2411_p1), [#allocation7], 16  }
  0x9a   : > { %1825 = vsyncadd (%p2412_p6), [#allocation7], 4294967280  ;;  %v1852_v0 = vmov 0.0   ;;  %vm1853_vm0 = vmmov 0   ;;  %v1606_v1 = vld [vmem:[#allocation6] sm:$0xff]   ;;  %v1607_v2 = vld [vmem:[#allocation6 + $0x8] sm:$0xff]  }
  0x9b   : > { %1474 = vmatprep.subr.bf16.mxu0 %v1852_v0  ;;  %1478 = vmatprep.mubr.msk.bf16.mxu0 %vm1853_vm0, %v1852_v0  ;;  %v525_v3 = vld [vmem:[%s433_s1] sm:$0xf]  ;;  %vm538_vm1 = vcmask 261120   ;;  %v2162_v5 = vld [vmem:[%s2367_s6 + $0x8] sm:$0xff]   ;;  %s524_s20 = sld [smem:[#allocation2]]  ;;  %p504_p10 = scmp.lt.s32.totalorder %s1944_s5, 1 }
  0x9c   : > { %1482 = vmatprep.subr.bf16.mxu1 %v1852_v0  ;;  %1486 = vmatprep.mubr.msk.bf16.mxu1 %vm1853_vm0, %v1852_v0  ;;  %v2153_v4 = vld [vmem:[%s2367_s6] sm:$0xff]   ;;  %v2175_v12 = vld [vmem:[#allocation9] ss:$0 sm:$0xff]  ;;  %s2414_s16 = sld [smem:[#allocation21_spill]]  ;;  %s1450_s23 = sshll.u32 %s1944_s5, 7 }
  0x9d   : > { %1475 = vmatpush3.bf16.msra.mxu0 %v1606_v1  ;;  %1483 = vmatpush3.bf16.msra.mxu1 %v2153_v4  ;;  %v2169_v6 = vld [vmem:[%s2129_s29] sm:$0xff]  ;;  %s505_s10 = scalar_select %p504_p10, %s1944_s5, 1 }
  0x9e   : > { %1476 = vmatprep.subr.bf16.mxu0 %v1852_v0  ;;  %1484 = vmatprep.subr.bf16.mxu1 %v1852_v0  ;;  %v1403_v8 = vld [vmem:[%s2364_s3] ss:$0 sm:$0xff]  ;;  %v1413_v35 = vld [vmem:[%s2364_s3 + $0x1] ss:$0 sm:$0xff]  ;;  %s2413_s29 = sld [smem:[#allocation20_spill]]  ;;  %s1199_s19 = scalar_lea.sflag [#allocation5], %s2115_s14 }
  0x9f   : > { %v2194_v28 = vld [vmem:[%s2368_s7] ss:$0 sm:$0xff]  ;;  %s1398_s8 = sshll.u32 %s505_s10, 3  ;;  %s491_s10 = scalar_lea.vmem [#allocation10], %s1395_s30 }
  0xa0   : > { %s511_s17 = scalar_lea.vmem %s2373_s12, %s1398_s8  ;;  %s507_s15 = scalar_lea.vmem %s2372_s11, %s1398_s8 }
  0xa1   : > { %1477 = vmatpush3.bf16.msra.mxu0 %v1607_v2  ;;  %1485 = vmatpush3.bf16.msra.mxu1 %v2162_v5  ;;  %v2186_v18 = vstv %s524_s20  ;;  %s1220_s8 = sshll.u32 %s491_s10, 4  ;;  %p2416_p4 = scmp.ne.s32.totalorder %s2400_s13, 0  ;;  %s2318_s8 = int_to_ptr.vmem [resolvable:$true] %s1220_s8 }
  0xa2   : > { %1490 = vmatprep.subr.bf16.mxu0 %v1852_v0  ;;  %1498 = vmatprep.subr.bf16.mxu1 %v1852_v0  ;;  %s1854_s5 = smov [#allocation10]  }
  0xa3   : > { %s1770_s30 = sshll.u32 %s1854_s5, 4  ;;  %s1771_s30 = int_to_ptr.vmem [resolvable:$false] %s1770_s30 }
  0xa4   : > { %1479 = vmatmul.mubr.msk.bf16.vlgmr.msra.gmra.mrb[0].mxu0 %vm538_vm1, %v525_v3  ;;  %s1772_s18 = scalar_lea.vmem %s1771_s30, 256  ;;  %p1773_p8 = scmp.lt.s32.totalorder %s2318_s8, %s1771_s30 }
  0xa5   : > { %1494 = vmatprep.mubr.msk.bf16.mxu0 %vm1853_vm0, %v1852_v0  ;;  %1491 = vmatpush3.bf16.msra.mxu0 %v2153_v4 }
  0xa6   : > { %1492 = vmatprep.subr.bf16.mxu0 %v1852_v0 }
  0xa9   : > { %1493 = vmatpush3.bf16.msra.mxu0 %v2162_v5 }
  0xaa   : > { %1506 = vmatprep.subr.bf16.mxu0 %v1852_v0 }
 0x177   : > { %v576_v7 = vpop.f32.mrb[0].mxu0 }
 0x178   : > { %v577_v9 = vadd.f32 %v576_v7, %v2169_v6  ;;  %v1480_v10 = vpop.f32.mrb[1].mxu0 }
 0x179   : > { %v579_v11 = vpop.f32.mrb[2].mxu0 }
 0x17a   : > { %v589_v13 = vadd.f32 %v1403_v8, %v577_v9  ;;  %v1481_v14 = vpop.f32.mrb[3].mxu0 }
 0x17c   : > { %v631_v15 = vpack.c.bf16 %v589_v13, %v589_v13  ;;  %v596_v16 = vmul.f32 %v2175_v12, %v589_v13 }
 0x17e   : > { %1487 = vmatmul.mubr.msk.bf16.vlgmr.msra.gmra.mrb[0].mxu1 %vm538_vm1, %v631_v15  ;;  %v597_v17 = vsel %vm538_vm1, %v596_v16, 0.0  ;;  %v1420_v16 = vld [vmem:[%s2364_s3 + $0x2] ss:$0 sm:$0xff] }
 0x17f   : > { %598 = vadd.xlane.f32.xlu0 %v597_v17  ;;  %1499 = vmatpush3.bf16.msra.mxu1 %v2153_v4 }
 0x180   : > { %1500 = vmatprep.subr.bf16.mxu1 %v1852_v0  ;;  %1502 = vmatprep.mubr.msk.bf16.mxu1 %vm1853_vm0, %v1852_v0 }
 0x183   : > { %1501 = vmatpush3.bf16.msra.mxu1 %v2162_v5 }
 0x184   : > { %1514 = vmatprep.subr.bf16.mxu1 %v1852_v0 }
 0x20c   : > { %v599_v19 = vpop.xlane.xlu0 %598 }
 0x20d   : > { %v601_v20 = vadd.f32 %v2186_v18, %v599_v19 }
 0x20f   : > { %v1405_v21 = vmul.f32 -1.442695, %v601_v20 }
 0x211   : > { %1610 = vpow2.f32 %v1405_v21 }
 0x21b   : > { %v1611_v22 = vpop.eup %1610 }
 0x21c   : > { %v605_v23 = vadd.f32 1.0, %v1611_v22 }
 0x21e   : > { %1612 = vrcp.f32 %v605_v23 }
 0x228   : > { %v1613_v24 = vpop.eup %1612 }
 0x229   : > { %vm613_vm2 = vcmp.gt.f32.partialorder %v1613_v24, 0.9  ;;  %vm617_vm3 = vcmp.le.f32.partialorder %v1613_v24, 0.9 }
 0x22a   : > { %v1406_v25 = vsel %vm613_vm2, 1.0, %v1852_v0  ;;  %v1407_v26 = vsel %vm617_vm3, 1.0, %v1852_v0 }
 0x22b   : > { %v629_v27 = vadd.f32 %v1407_v26, %v1406_v25  ;;  %v621_v44 = vmul.f32 %v1613_v24, %v1407_v26 }
 0x22d   : > { %v623_v45 = vsub.f32 1.0, %v621_v44 }
 0x22f   : > { %v624_v46 = vmul.f32 %v1406_v25, %v623_v45 }
 0x231   : > { %v626_v49 = vmul.f32 %v1406_v25, %v624_v46 }
 0x233   : > { %v627_v50 = vadd.f32 %v626_v49, %v621_v44 }
 0x235   : > { %vm717_vm4 = vcmp.lt.f32.partialorder %v627_v50, 1.0 }
 0x236   : > { %v1415_v52 = vsel %vm717_vm4, 1.0, %v1852_v0  ;;  %vm1195_vm4 = vcmask 7168  }
 0x251   : > { %v687_v29 = vpop.f32.mrb[0].mxu1 }
 0x252   : > { %v688_v30 = vadd.f32 %v2194_v28, %v687_v29  ;;  %v1488_v31 = vpop.f32.mrb[1].mxu1 }
 0x253   : > { %v690_v32 = vpop.f32.mrb[2].mxu1 }
 0x254   : > { %1614 = vtanh.f32 %v688_v30  ;;  %v1489_v33 = vpop.f32.mrb[3].mxu1 }
 0x25e   : > { %v1615_v34 = vpop.eup %1614 }
 0x25f   : > { %v696_v36 = vadd.f32 %v1615_v34, %v2169_v6  ;;  %v694_v14 = vmul.f32 %v1615_v34, %v627_v50 }
 0x261   : > { %v705_v37 = vadd.f32 %v1413_v35, %v696_v36 }
 0x263   : > { %v740_v38 = vpack.c.bf16 %v705_v37, %v705_v37  ;;  %v706_v39 = vmul.f32 %v2175_v12, %v705_v37 }
 0x265   : > { %1495 = vmatmul.mubr.msk.bf16.vlgmr.msra.gmra.mrb[4].mxu0 %vm538_vm1, %v740_v38  ;;  %v707_v40 = vsel %vm538_vm1, %v706_v39, 0.0 }
 0x266   : > { %708 = vadd.xlane.f32.xlu0 %v707_v40  ;;  %1507 = vmatpush3.bf16.msra.mxu0 %v2153_v4 }
 0x267   : > { %1508 = vmatprep.subr.bf16.mxu0 %v1852_v0  ;;  %1510 = vmatprep.mubr.msk.bf16.mxu0 %vm1853_vm0, %v1852_v0 }
 0x26a   : > { %1509 = vmatpush3.bf16.msra.mxu0 %v2162_v5 }
 0x26b   : > { %1522 = vmatprep.subr.bf16.mxu0 %v1852_v0 }
 0x2f3   : > { %v709_v41 = vpop.xlane.xlu0 %708 }
 0x2f4   : > { %v710_v42 = vadd.f32 %v709_v41, %v2186_v18 }
 0x2f6   : > { %v1414_v43 = vmul.f32 -1.442695, %v710_v42 }
 0x2f8   : > { %1616 = vpow2.f32 %v1414_v43 }
 0x302   : > { %v1617_v47 = vpop.eup %1616 }
 0x303   : > { %v714_v48 = vadd.f32 1.0, %v1617_v47 }
 0x305   : > { %1618 = vrcp.f32 %v714_v48 }
 0x30f   : > { %v1619_v51 = vpop.eup %1618 }
 0x310   : > { %v720_v53 = vmul.f32 %v1619_v51, %v1415_v52 }
 0x312   : > { %v721_v54 = vadd.f32 %v720_v53, %v627_v50 }
 0x314   : > { %vm722_vm5 = vcmp.gt.f32.partialorder %v721_v54, 0.9  ;;  %vm726_vm6 = vcmp.le.f32.partialorder %v721_v54, 0.9  ;;  %v1427_v54 = vld [vmem:[%s2364_s3 + $0x3] ss:$0 sm:$0xff] }
 0x315   : > { %v1416_v55 = vsel %vm722_vm5, 1.0, %v1852_v0  ;;  %v1417_v56 = vsel %vm726_vm6, 1.0, %v1852_v0 }
 0x316   : > { %v729_v57 = vmul.f32 %v1417_v56, %v1415_v52  ;;  %v725_v58 = vmul.f32 %v1416_v55, %v1415_v52 }
 0x318   : > { %v730_v59 = vmul.f32 %v1619_v51, %v729_v57  ;;  %v737_v60 = vadd.f32 %v729_v57, %v629_v27 }
 0x31a   : > { %v731_v61 = vadd.f32 %v730_v59, %v627_v50  ;;  %v2214_v62 = vadd.f32 %v737_v60, %v725_v58 }
 0x31c   : > { %v732_v63 = vsub.f32 1.0, %v731_v61 }
 0x31e   : > { %v733_v1 = vmul.f32 %v732_v63, %v725_v58 }
 0x320   : > { %v734_v2 = vadd.f32 %v733_v1, %v624_v46 }
 0x322   : > { %v735_v3 = vmul.f32 %v734_v2, %v725_v58 }
 0x324   : > { %v739_v7 = vadd.f32 %v735_v3, %v730_v59  ;;  %v736_v32 = vadd.f32 %v735_v3, %v731_v61 }
 0x326   : > { %vm809_vm7 = vcmp.lt.f32.partialorder %v736_v32, 1.0 }
 0x327   : > { %v1422_v34 = vsel %vm809_vm7, 1.0, %v1852_v0 }
 0x338   : > { %v778_v8 = vpop.f32.mrb[4].mxu0 }
 0x339   : > { %v779_v9 = vadd.f32 %v2194_v28, %v778_v8  ;;  %v1496_v10 = vpop.f32.mrb[5].mxu0 }
 0x33a   : > { %v781_v11 = vpop.f32.mrb[6].mxu0 }
 0x33b   : > { %1620 = vtanh.f32 %v779_v9  ;;  %v1497_v13 = vpop.f32.mrb[7].mxu0 }
 0x345   : > { %v1621_v15 = vpop.eup %1620 }
 0x346   : > { %v785_v17 = vsub.f32 %v1621_v15, %v694_v14  ;;  %v788_v19 = vadd.f32 %v1621_v15, %v2169_v6 }
 0x348   : > { %v797_v20 = vadd.f32 %v1420_v16, %v788_v19  ;;  %v786_v21 = vmul.f32 %v785_v17, %v739_v7 }
 0x34a   : > { %v832_v22 = vpack.c.bf16 %v797_v20, %v797_v20  ;;  %v798_v23 = vmul.f32 %v2175_v12, %v797_v20  ;;  %v787_v24 = vadd.f32 %v786_v21, %v694_v14 }
 0x34c   : > { %1503 = vmatmul.mubr.msk.bf16.vlgmr.msra.gmra.mrb[4].mxu1 %vm538_vm1, %v832_v22  ;;  %v799_v25 = vsel %vm538_vm1, %v798_v23, 0.0 }
 0x34d   : > { %800 = vadd.xlane.f32.xlu1 %v799_v25  ;;  %1515 = vmatpush3.bf16.msra.mxu1 %v2153_v4 }
 0x34e   : > { %1516 = vmatprep.subr.bf16.mxu1 %v1852_v0  ;;  %1518 = vmatprep.mubr.msk.bf16.mxu1 %vm1853_vm0, %v1852_v0 }
 0x351   : > { %1517 = vmatpush3.bf16.msra.mxu1 %v2162_v5 }
 0x3da   : > { %v801_v26 = vpop.xlane.xlu1 %800 }
 0x3db   : > { %v802_v27 = vadd.f32 %v801_v26, %v2186_v18 }
 0x3dd   : > { %v1421_v29 = vmul.f32 -1.442695, %v802_v27 }
 0x3df   : > { %1622 = vpow2.f32 %v1421_v29 }
 0x3e9   : > { %v1623_v30 = vpop.eup %1622 }
 0x3ea   : > { %v806_v31 = vadd.f32 1.0, %v1623_v30 }
 0x3ec   : > { %1624 = vrcp.f32 %v806_v31 }
 0x3f6   : > { %v1625_v33 = vpop.eup %1624 }
 0x3f7   : > { %v812_v35 = vmul.f32 %v1625_v33, %v1422_v34 }
 0x3f9   : > { %v813_v36 = vadd.f32 %v812_v35, %v736_v32 }
 0x3fb   : > { %vm818_vm8 = vcmp.le.f32.partialorder %v813_v36, 0.9  ;;  %vm814_vm9 = vcmp.gt.f32.partialorder %v813_v36, 0.9 }
 0x3fc   : > { %v1424_v37 = vsel %vm818_vm8, 1.0, %v1852_v0  ;;  %v1423_v40 = vsel %vm814_vm9, 1.0, %v1852_v0 }
 0x3fd   : > { %v2232_v38 = vmul.f32 %v1424_v37, %v1422_v34  ;;  %v2236_v42 = vmul.f32 %v1423_v40, %v1422_v34 }
 0x3ff   : > { %v822_v39 = vmul.f32 %v1625_v33, %v2232_v38 }
 0x401   : > { %v823_v41 = vadd.f32 %v822_v39, %v736_v32  ;;  %v1434_v32 = vld [vmem:[%s2364_s3 + $0x4] ss:$0 sm:$0xff] }
 0x403   : > { %v824_v43 = vsub.f32 1.0, %v823_v41 }
 0x405   : > { %v825_v44 = vmul.f32 %v824_v43, %v2236_v42 }
 0x407   : > { %v826_v45 = vadd.f32 %v825_v44, %v734_v2 }
 0x409   : > { %v827_v46 = vmul.f32 %v826_v45, %v2236_v42 }
 0x40b   : > { %v831_v47 = vadd.f32 %v827_v46, %v822_v39  ;;  %v828_v9 = vadd.f32 %v827_v46, %v823_v41 }
 0x40d   : > { %vm901_vm10 = vcmp.lt.f32.partialorder %v828_v9, 1.0 }
 0x41f   : > { %v870_v48 = vpop.f32.mrb[4].mxu1 }
 0x420   : > { %v871_v49 = vadd.f32 %v2194_v28, %v870_v48  ;;  %v1504_v50 = vpop.f32.mrb[5].mxu1 }
 0x421   : > { %v873_v51 = vpop.f32.mrb[6].mxu1 }
 0x422   : > { %1626 = vtanh.f32 %v871_v49  ;;  %v1505_v52 = vpop.f32.mrb[7].mxu1 }
 0x42c   : > { %v1627_v53 = vpop.eup %1626 }
 0x42d   : > { %v880_v55 = vadd.f32 %v1627_v53, %v2169_v6  ;;  %v877_v56 = vsub.f32 %v1627_v53, %v787_v24 }
 0x42f   : > { %v889_v57 = vadd.f32 %v1427_v54, %v880_v55  ;;  %v878_v58 = vmul.f32 %v877_v56, %v831_v47 }
 0x431   : > { %v924_v59 = vpack.c.bf16 %v889_v57, %v889_v57  ;;  %v890_v60 = vmul.f32 %v2175_v12, %v889_v57  ;;  %v879_v61 = vadd.f32 %v878_v58, %v787_v24 }
 0x433   : > { %1511 = vmatmul.mubr.msk.bf16.vlgmr.msra.gmra.mrb[8].mxu0 %vm538_vm1, %v924_v59  ;;  %v891_v63 = vsel %vm538_vm1, %v890_v60, 0.0 }
 0x434   : > { %892 = vadd.xlane.f32.xlu1 %v891_v63  ;;  %1523 = vmatpush3.bf16.msra.mxu0 %v2153_v4  ;;  %v1429_v4 = vsel %vm901_vm10, 1.0, %v1852_v0 }
 0x435   : > { %1524 = vmatprep.subr.bf16.mxu0 %v1852_v0  ;;  %1526 = vmatprep.mubr.msk.bf16.mxu0 %vm1853_vm0, %v1852_v0 }
 0x438   : > { %1525 = vmatpush3.bf16.msra.mxu0 %v2162_v5 }
 0x4c1   : > { %v893_v1 = vpop.xlane.xlu1 %892 }
 0x4c2   : > { %v894_v2 = vadd.f32 %v893_v1, %v2186_v18 }
 0x4c4   : > { %v1428_v3 = vmul.f32 -1.442695, %v894_v2 }
 0x4c6   : > { %1628 = vpow2.f32 %v1428_v3 }
 0x4d0   : > { %v1629_v7 = vpop.eup %1628 }
 0x4d1   : > { %v898_v8 = vadd.f32 1.0, %v1629_v7 }
 0x4d3   : > { %1630 = vrcp.f32 %v898_v8 }
 0x4dd   : > { %v1631_v10 = vpop.eup %1630 }
 0x4de   : > { %v904_v11 = vmul.f32 %v1631_v10, %v1429_v4 }
 0x4e0   : > { %v905_v13 = vadd.f32 %v904_v11, %v828_v9 }
 0x4e2   : > { %vm910_vm11 = vcmp.le.f32.partialorder %v905_v13, 0.9  ;;  %vm906_vm12 = vcmp.gt.f32.partialorder %v905_v13, 0.9 }
 0x4e3   : > { %v1431_v14 = vsel %vm910_vm11, 1.0, %v1852_v0  ;;  %v1430_v16 = vsel %vm906_vm12, 1.0, %v1852_v0 }
 0x4e4   : > { %v2256_v5 = vmul.f32 %v1431_v14, %v1429_v4  ;;  %v2260_v19 = vmul.f32 %v1430_v16, %v1429_v4 }
 0x4e6   : > { %v914_v15 = vmul.f32 %v1631_v10, %v2256_v5  ;;  %v1441_v10 = vld [vmem:[%s2364_s3 + $0x5] ss:$0 sm:$0xff] }
 0x4e8   : > { %v915_v17 = vadd.f32 %v914_v15, %v828_v9 }
 0x4ea   : > { %v916_v20 = vsub.f32 1.0, %v915_v17 }
 0x4ec   : > { %v917_v21 = vmul.f32 %v916_v20, %v2260_v19 }
 0x4ee   : > { %v918_v22 = vadd.f32 %v917_v21, %v826_v45 }
 0x4f0   : > { %v919_v23 = vmul.f32 %v918_v22, %v2260_v19 }
 0x4f2   : > { %v923_v24 = vadd.f32 %v919_v23, %v914_v15  ;;  %v920_v48 = vadd.f32 %v919_v23, %v915_v17 }
 0x4f4   : > { %vm993_vm13 = vcmp.lt.f32.partialorder %v920_v48, 1.0 }
 0x4f5   : > { %v1436_v50 = vsel %vm993_vm13, 1.0, %v1852_v0 }
 0x506   : > { %v962_v25 = vpop.f32.mrb[8].mxu0 }
 0x507   : > { %v963_v26 = vadd.f32 %v2194_v28, %v962_v25  ;;  %v1512_v27 = vpop.f32.mrb[9].mxu0 }
 0x508   : > { %v965_v29 = vpop.f32.mrb[10].mxu0 }
 0x509   : > { %1632 = vtanh.f32 %v963_v26  ;;  %v1513_v30 = vpop.f32.mrb[11].mxu0  ;;  %v829_v26 = vadd.f32 %v2232_v38, %v2214_v62 }
 0x50b   : > { %v830_v27 = vadd.f32 %v829_v26, %v2236_v42 }
 0x50d   : > { %v921_v29 = vadd.f32 %v2256_v5, %v830_v27 }
 0x513   : > { %v1633_v31 = vpop.eup %1632 }
 0x514   : > { %v972_v33 = vadd.f32 %v1633_v31, %v2169_v6  ;;  %v969_v34 = vsub.f32 %v1633_v31, %v879_v61 }
 0x516   : > { %v981_v35 = vadd.f32 %v1434_v32, %v972_v33  ;;  %v970_v36 = vmul.f32 %v969_v34, %v923_v24 }
 0x518   : > { %v1016_v37 = vpack.c.bf16 %v981_v35, %v981_v35  ;;  %v982_v39 = vmul.f32 %v2175_v12, %v981_v35  ;;  %v971_v40 = vadd.f32 %v970_v36, %v879_v61 }
 0x51a   : > { %1519 = vmatmul.mubr.msk.bf16.vlgmr.msra.gmra.mrb[8].mxu1 %vm538_vm1, %v1016_v37  ;;  %v983_v41 = vsel %vm538_vm1, %v982_v39, 0.0 }
 0x51b   : > { %984 = vadd.xlane.f32.xlu0 %v983_v41 }
 0x5a8   : > { %v985_v43 = vpop.xlane.xlu0 %984 }
 0x5a9   : > { %v986_v44 = vadd.f32 %v985_v43, %v2186_v18 }
 0x5ab   : > { %v1435_v45 = vmul.f32 -1.442695, %v986_v44 }
 0x5ad   : > { %1634 = vpow2.f32 %v1435_v45 }
 0x5b7   : > { %v1635_v46 = vpop.eup %1634 }
 0x5b8   : > { %v990_v47 = vadd.f32 1.0, %v1635_v46 }
 0x5ba   : > { %1636 = vrcp.f32 %v990_v47 }
 0x5c4   : > { %v1637_v49 = vpop.eup %1636 }
 0x5c5   : > { %v996_v51 = vmul.f32 %v1637_v49, %v1436_v50 }
 0x5c7   : > { %v997_v52 = vadd.f32 %v996_v51, %v920_v48 }
 0x5c9   : > { %vm1002_vm14 = vcmp.le.f32.partialorder %v997_v52, 0.9  ;;  %vm998_vm15 = vcmp.gt.f32.partialorder %v997_v52, 0.9 }
 0x5ca   : > { %v1438_v53 = vsel %vm1002_vm14, 1.0, %v1852_v0  ;;  %v1437_v57 = vsel %vm998_vm15, 1.0, %v1852_v0 }
 0x5cb   : > { %v1005_v54 = vmul.f32 %v1438_v53, %v1436_v50  ;;  %v1001_v60 = vmul.f32 %v1437_v57, %v1436_v50 }
 0x5cd   : > { %v1006_v55 = vmul.f32 %v1637_v49, %v1005_v54 }
 0x5cf   : > { %v1007_v56 = vadd.f32 %v1006_v55, %v920_v48 }
 0x5d1   : > { %v1008_v58 = vsub.f32 1.0, %v1007_v56 }
 0x5d3   : > { %v1009_v2 = vmul.f32 %v1008_v58, %v1001_v60 }
 0x5d5   : > { %v1010_v7 = vadd.f32 %v1009_v2, %v918_v22 }
 0x5d7   : > { %v1011_v8 = vmul.f32 %v1010_v7, %v1001_v60 }
 0x5d9   : > { %v1015_v11 = vadd.f32 %v1011_v8, %v1006_v55 }
 0x5ed   : > { %v1054_v59 = vpop.f32.mrb[8].mxu1 }
 0x5ee   : > { %v1055_v61 = vadd.f32 %v2194_v28, %v1054_v59  ;;  %v1520_v63 = vpop.f32.mrb[9].mxu1 }
 0x5ef   : > { %v1057_v1 = vpop.f32.mrb[10].mxu1 }
 0x5f0   : > { %1638 = vtanh.f32 %v1055_v61  ;;  %v1521_v3 = vpop.f32.mrb[11].mxu1 }
 0x5fa   : > { %v1639_v9 = vpop.eup %1638 }
 0x5fb   : > { %v1064_v4 = vadd.f32 %v1639_v9, %v2169_v6  ;;  %v1061_v13 = vsub.f32 %v1639_v9, %v971_v40  ;;  %v1447_v9 = vld [vmem:[%s2413_s29] ss:$0 sm:$0xff] }
 0x5fd   : > { %v1073_v14 = vadd.f32 %v1441_v10, %v1064_v4  ;;  %v1062_v15 = vmul.f32 %v1061_v13, %v1015_v11  ;;  %v1448_v4 = vld [vmem:[%s2414_s16] ss:$0 sm:$0xff] }
 0x5ff   : > { %v1107_v16 = vpack.c.bf16 %v1073_v14, %v1073_v14  ;;  %v1074_v17 = vmul.f32 %v2175_v12, %v1073_v14  ;;  %v1063_v20 = vadd.f32 %v1062_v15, %v971_v40  ;;  %v1012_v12 = vadd.f32 %v1011_v8, %v1007_v56 }
 0x601   : > { %1527 = vmatmul.mubr.msk.bf16.vlgmr.msra.gmra.mrb[12].mxu0 %vm538_vm1, %v1107_v16  ;;  %v1075_v21 = vsel %vm538_vm1, %v1074_v17, 0.0  ;;  %vm1085_vm0 = vcmp.lt.f32.partialorder %v1012_v12, 1.0 }
 0x602   : > { %1076 = vadd.xlane.f32.xlu1 %v1075_v21  ;;  %v1443_v31 = vsel %vm1085_vm0, 1.0, %v1852_v0 }
 0x68f   : > { %v1077_v22 = vpop.xlane.xlu1 %1076 }
 0x690   : > { %v1078_v23 = vadd.f32 %v1077_v22, %v2186_v18  ;;  %v922_v18 = vadd.f32 %v921_v29, %v2260_v19 }
 0x692   : > { %v1442_v24 = vmul.f32 -1.442695, %v1078_v23  ;;  %v1013_v33 = vadd.f32 %v1005_v54, %v922_v18 }
 0x694   : > { %1640 = vpow2.f32 %v1442_v24  ;;  %v1014_v42 = vadd.f32 %v1013_v33, %v1001_v60 }
 0x69e   : > { %v1641_v6 = vpop.eup %1640 }
 0x69f   : > { %v1082_v25 = vadd.f32 1.0, %v1641_v6 }
 0x6a1   : > { %1642 = vrcp.f32 %v1082_v25 }
 0x6ab   : > { %v1643_v30 = vpop.eup %1642 }
 0x6ac   : > { %v1088_v32 = vmul.f32 %v1643_v30, %v1443_v31 }
 0x6ae   : > { %v1089_v34 = vadd.f32 %v1088_v32, %v1012_v12 }
 0x6b0   : > { %vm1090_vm2 = vcmp.gt.f32.partialorder %v1089_v34, 0.9  ;;  %vm1094_vm3 = vcmp.le.f32.partialorder %v1089_v34, 0.9 }
 0x6b1   : > { %v1444_v62 = vsel %vm1090_vm2, 1.0, %v1852_v0  ;;  %v1445_v38 = vsel %vm1094_vm3, 1.0, %v1852_v0 }
 0x6b2   : > { %v1097_v5 = vmul.f32 %v1445_v38, %v1443_v31  ;;  %v1093_v35 = vmul.f32 %v1444_v62, %v1443_v31 }
 0x6b4   : > { %v1098_v36 = vmul.f32 %v1643_v30, %v1097_v5  ;;  %v1103_v37 = vadd.f32 %v1097_v5, %v1014_v42 }
 0x6b6   : > { %v1099_v19 = vadd.f32 %v1098_v36, %v1012_v12  ;;  %v1104_v39 = vadd.f32 %v1103_v37, %v1093_v35 }
 0x6b8   : > { %v1100_v40 = vsub.f32 1.0, %v1099_v19  ;;  %1197 = vst.msk [vmem:[%s511_s17] sm:$0xff] %vm1195_vm4, %v1104_v39  ;;  %s2415_s17 = sld [smem:[#allocation22_spill]] }
 0x6ba   : > { %v1101_v41 = vmul.f32 %v1100_v40, %v1093_v35 }
 0x6bc   : > { %v1102_v0 = vadd.f32 %v1101_v41, %v1010_v7 }
 0x6be   : > { %1196 = vst.msk [vmem:[%s507_s15] sm:$0xff] %vm1195_vm4, %v1102_v0  ;;  %v1105_v48 = vmul.f32 %v1102_v0, %v1093_v35  ;;  %s2316_s21 = scalar_lea.hbm %s2415_s17, %s1450_s23  ;;  %s1766_s15 = scalar_lea.vmem %s2318_s8, 128 }
 0x6bf   : > { %p1767_p3 = scmp.ne.s32.totalorder %s2318_s8, %s1766_s15  ;;  %p1774_p2 = scmp.lt.s32.totalorder %s1772_s18, %s1766_s15 }
 0x6c0   : > { %v1106_v50 = vadd.f32 %v1105_v48, %v1098_v36 }
 0x6c1   : > { %p1768_p9 = pnand %p1767_p3, %p2416_p4  ;;  %p1775_p11 = por %p1774_p2, %p1773_p8 }
 0x6c3   : > { %p1769_p13 = pneg %p1768_p9 }
 0x6c5   : > { %p1776_p7 = pnand %p1775_p11, %p1769_p13 }
 0x6d4   : > { %v1145_v43 = vpop.f32.mrb[12].mxu0 }
 0x6d5   : > { %v1146_v44 = vadd.f32 %v2194_v28, %v1145_v43  ;;  %v1528_v45 = vpop.f32.mrb[13].mxu0 }
 0x6d6   : > { %v1148_v46 = vpop.f32.mrb[14].mxu0 }
 0x6d7   : > { %1644 = vtanh.f32 %v1146_v44  ;;  %v1529_v47 = vpop.f32.mrb[15].mxu0 }
 0x6e1   : > { %v1645_v49 = vpop.eup %1644 }
 0x6e2   : > { %v1152_v51 = vsub.f32 %v1645_v49, %v1063_v20 }
 0x6e4   : > { %v1153_v52 = vmul.f32 %v1152_v51, %v1106_v50 }
 0x6e6   : > { %v1154_v53 = vadd.f32 %v1153_v52, %v1063_v20 }
 0x6e8   : > { %v1155_v54 = vsel %vm538_vm1, %v1154_v53, 0.0 }
 0x6e9   : > { %1156 = vadd.xlane.f32.xlu0 %v1155_v54 }
 0x776   : > { %v1157_v55 = vpop.xlane.xlu0 %1156 }
 0x777   : > { %v1159_v56 = vmul.f32 0.03125, %v1157_v55 }
 0x779   : > { %v1160_v57 = vsub.f32 %v1154_v53, %v1159_v56 }
 0x77b   : > { %v1161_v58 = vmul.f32 %v1160_v57, %v1160_v57 }
 0x77d   : > { %v1162_v59 = vsel %vm538_vm1, %v1161_v58, 0.0 }
 0x77e   : > { %1163 = vadd.xlane.f32.xlu1 %v1162_v59 }
 0x80b   : > { %v1164_v28 = vpop.xlane.xlu1 %1163 }
 0x80c   : > { %v1166_v60 = vmul.f32 0.032258064, %v1164_v28 }
 0x80e   : > { %1646 = vrsqrt.f32 %v1166_v60  ;;  %vm1169_vm5 = vcmp.eq.f32.partialorder %v1166_v60, inf  ;;  %v1172_v1 = vand.u32 2147483648, %v1166_v60  ;;  %vm1171_vm6 = vcmp.eq.f32.partialorder %v1166_v60, 0.0 }
 0x818   : > { %v1647_v61 = vpop.eup %1646 }
 0x819   : > { %v1168_v63 = vmul.f32 %v1647_v61, %v1166_v60 }
 0x81b   : > { %v1170_v2 = vsel %vm1169_vm5, %v1166_v60, %v1168_v63 }
 0x81c   : > { %v1173_v3 = vsel %vm1171_vm6, %v1172_v1, %v1170_v2 }
 0x81d   : > { %v1174_v7 = vadd.f32 1e-06, %v1173_v3 }
 0x81f   : > { %1648 = vrcp.f32 %v1174_v7 }
 0x829   : > { %v1649_v8 = vpop.eup %1648 }
 0x82a   : > { %v1178_v10 = vmul.f32 %v1649_v8, %v1160_v57 }
 0x82c   : > { %v1185_v11 = vmul.f32 %v1447_v9, %v1178_v10 }
 0x82e   : > { %v1193_v13 = vadd.f32 %v1448_v4, %v1185_v11 }
 0x830   : > { %1194 = vst.msk [vmem:[%s491_s10] sm:$0xff] %vm538_vm1, %v1193_v13 }
 0x831   : > { %1779 = shalt.err (!%p1776_p7)
}
 0x832   : > { %s1780_s14 = scalar_lea.hbm %s2316_s21, 128  ;;  %s1784_s28 = scalar_lea.hbm %s2415_s17, 256 }
 0x833   : > { %p1781_p5 = scmp.ne.s32.totalorder %s2316_s21, %s1780_s14  ;;  %p1785_p1 = scmp.lt.u32.totalorder %s2316_s21, %s2415_s17 }
 0x834   : > { %p1786_p6 = scmp.lt.u32.totalorder %s1784_s28, %s1780_s14  ;;  %p1788_p3 = scmp.lt.u32.totalorder %s1780_s14, %s2316_s21 }
 0x835   : > { %p1782_p0 = pnand %p1781_p5, %p2416_p4 }
 0x836   : > { %p1787_p10 = por %p1786_p6, %p1785_p1 }
 0x837   : > { %p1783_p12 = pneg %p1782_p0 }
 0x838   : > { %p1789_p9 = por %p1788_p3, %p1787_p10 }
 0x83a   : > { %p1790_p13 = pnand %p1789_p9, %p1783_p12 }
 0x83c   : > { %1793 = shalt.err (!%p1790_p13)
}
 0x83d   : > { %1542 = dma.vmem_to_hbm [thread:$0]  (%p2416_p4), %s2318_s8, 128, %s2316_s21, %s1199_s19  }
 0x83e PF: > { %s2417_s23 = sld [smem:[#allocation16_spill]]  ;;  %s2418_s10 = sld [smem:[#allocation17_spill]] }
 0x83f   : > { %p2420_p2 = scmp.ge.s32.totalorder %s1844_s26, 2 }
 0x844   : > { %s1238_s20 = sand.u32 1, %s2417_s23   ;;  %p2419_p8 = scmp.ne.s32.totalorder %s2418_s10, 0 }
 0x845   : > { %s1239_s22 = scalar_lea.sflag [#allocation5], %s1238_s20 }
 0x846   : > { %p1559_p11 = pnand %p2420_p2, %p2419_p8 }
 0x848   : > { %1827 = dma.done.wait (!%p1559_p11), %s1239_s22, 128  }
 0x849   : > { %1829 = vsyncadd (!%p1559_p11), %s1239_s22, 4294967168  ;;  %s2421_s26 = sld [smem:[#allocation18_spill]]  ;;  %s2422_s23 = smov %s1836_s24 }
 0x84a   : > { %s2423_s24 = smov %s1840_s25  ;;  %s2424_s25 = smov %s2016_s27 }
 0x84f   : > { %p28_p7 = scmp.ge.s32.totalorder %s2421_s26, 4  }
 0x851   :  { %30 = sbr.rel (!%p28_p7) target bundleno = 12 (0xc), region = 153 }
 0x858   :  { %1258 = vsyncpa [#allocation4], 1 }
 0x859   :  { %1260 = vsyncpa [#allocation4 + $0x1], 1 }
 0x85a   :  { %1261 = vsyncpa [#allocation7], 1 }
 0x85b   :  { %1262 = vsyncpa [#allocation5], 1 }
 0x85c   :  { %1264 = vsyncpa [#allocation5 + $0x1], 1 }

</bundles_post_ra>
